<compile_context>
chip_gen: v6e
topology: v6e:2x2x1
jax: 0.10.0
libtpu: 0.0.40
codegen_flags: <defaults>
</compile_context>

<pallas_src>
import functools

import jax
import jax.numpy as jnp
from jax import lax
from jax.experimental import pallas as pl
from jax.experimental.pallas import tpu as pltpu


# ----------------------------------------------------------------------------
# Parameter-side glue (small, runs once per forward on (r, b, b) matrices).
# ----------------------------------------------------------------------------
def cayley_blocks_from_vec(oft_vec: jnp.ndarray, block_size: int) -> jnp.ndarray:
    """oft_vec: (r, b*(b-1)//2) -> orthogonal blocks (r, b, b), float32."""
    r = oft_vec.shape[0]
    rows, cols = jnp.triu_indices(block_size, k=1)
    S = jnp.zeros((r, block_size, block_size), dtype=jnp.float32)
    S = S.at[:, rows, cols].set(oft_vec.astype(jnp.float32))
    S = S - jnp.swapaxes(S, -1, -2)                       # skew-symmetric
    I = jnp.eye(block_size, dtype=jnp.float32)[None]
    # torch.linalg.solve(I + S, I - S, left=False):  R (I + S) = (I - S)
    At = jnp.swapaxes(I + S, -1, -2)
    Bt = jnp.swapaxes(I - S, -1, -2)
    return jnp.swapaxes(jnp.linalg.solve(At, Bt), -1, -2)


def fold_rotation_into_weight(W: jnp.ndarray, R: jnp.ndarray,
                              block_size: int) -> jnp.ndarray:
    """Return blockdiag(R) @ W^T with shape (K, N), computed in W.dtype.

    bf16 operands + fp32 accumulation: no fp32 (K, N) intermediate is
    materialized (halves the fold's HBM traffic).  For serving with static
    W / R, compute once and pass to awq_oft_linear(..., folded_weight=...).
    """
    N, K = W.shape
    nb = K // block_size
    Wn = W.reshape(N, nb, block_size)                     # stays in W.dtype
    Rw = R.astype(W.dtype)
    # W'[(j,a), n] = sum_b R[j,a,b] * W[n, (j,b)]
    Wp = jnp.einsum("jab,njb->jan", Rw, Wn,
                    preferred_element_type=jnp.float32)
    return Wp.reshape(K, N).astype(W.dtype)


def rotate_activations(x2: jnp.ndarray, R: jnp.ndarray,
                       block_size: int) -> jnp.ndarray:
    """Rotate x (M, K) block-wise in fp32 and cast back (matches torch path)."""
    M, K = x2.shape
    nb = K // block_size
    xb = x2.reshape(M, nb, block_size).astype(jnp.float32)
    xr = jnp.einsum("mjb,jbc->mjc", xb, R)
    return xr.reshape(M, K).astype(x2.dtype)


# ----------------------------------------------------------------------------
# Pallas kernel: tiled matmul, fp32 accumulator (bias folded into init).
# ----------------------------------------------------------------------------
def _matmul_bias_kernel(x_ref, w_ref, b_ref, o_ref, acc_ref, *, w_is_nk):
    k = pl.program_id(2)

    @pl.when(k == 0)
    def _init():
        # Bias folded into the accumulator init -> epilogue is cast+store only.
        acc_ref[...] = jnp.broadcast_to(b_ref[...], acc_ref.shape)

    if w_is_nk:
        # Weight tile in its native (out, in) = (tn, tk) layout; contract last dims.
        acc_ref[...] += lax.dot_general(
            x_ref[...], w_ref[...],
            dimension_numbers=(((1,), (1,)), ((), ())),
            preferred_element_type=jnp.float32)
    else:
        # Pre-folded rotated weight, canonical (tk, tn) layout.
        acc_ref[...] += jnp.dot(x_ref[...], w_ref[...],
                                preferred_element_type=jnp.float32)

    @pl.when(k == pl.num_programs(2) - 1)
    def _fin():
        o_ref[...] = acc_ref[...].astype(o_ref.dtype)


# ----------------------------------------------------------------------------
# Tiling / VMEM helpers.
# ----------------------------------------------------------------------------
def _round_up(a: int, b: int) -> int:
    return (a + b - 1) // b * b


def _vmem_capacity_bytes() -> int:
    try:
        info = pltpu.get_tpu_info()
        cap = getattr(info, "vmem_capacity_bytes", None)
        if cap:
            return int(cap)
    except Exception:
        pass
    return 64 << 20   # conservative fallback (v7x per-core VMEM)


def _estimate_vmem(tm, tn, tk, itx, itw, ito, w_buffers):
    return (2 * tm * tk * itx            # x tiles (double-buffered)
            + w_buffers * tk * tn * itw  # weight tiles
            + 2 * tn * 4                 # bias tiles (fp32)
            + 2 * tm * tn * ito          # output tiles
            + tm * tn * 4)               # fp32 accumulator scratch


def _select_tiles(M, N, K, itx, itw, ito, budget, tile_m, small_m):
    if small_m:
        tm = max(16, _round_up(M, 16))       # multiple of 16: clean bf16 packing
        # Decode: collapse the grid to 1-2 steps.  Prefer two N-blocks so both
        # v7x TensorCores get a parallel block (negligible cost on v5e/v6e).
        tn_c = []
        if N % 256 == 0:
            tn_c.append(N // 2)
        tn_c += [N] + [c for c in (2048, 1024, 512, 384, 256, 128)
                       if c < N and N % c == 0]
        tk_c = [K] + [c for c in (4096, 2048, 1024, 512, 256, 128)
                      if c < K and K % c == 0]
    else:
        tm = min(tile_m, max(16, _round_up(M, 16)))
        tn_c = [c for c in (1024, 768, 512, 384, 256, 128)
                if c <= N and N % c == 0] or [N]
        tk_c = [c for c in (1024, 512, 256, 128)
                if c <= K and K % c == 0] or [K]
    for tn in tn_c:
        for tk in tk_c:
            if _estimate_vmem(tm, tn, tk, itx, itw, ito, 2) <= budget:
                return tm, tn, tk
    return tm, tn_c[-1], tk_c[-1]


# ----------------------------------------------------------------------------
# Forward wrapper.
# ----------------------------------------------------------------------------
def awq_oft_linear(x, oft_vec, W, bias=None, *, oft_block_size=32,
                   tile_m=512, folded_weight=None):
    """Forward of AwqOFTLinear.

    x:             (..., in_features)                   model dtype (e.g. bf16)
    oft_vec:       (r, b*(b-1)//2) OFT skew parameters  (r = in_features // b)
    W:             (out_features, in_features)          dequantized base weight
    bias:          (out_features,) or None
    folded_weight: optional precomputed fold_rotation_into_weight(W, R, b)
                   (K, N); pass it at serving time so the fold is free.
    """
    in_features = x.shape[-1]
    out_features = W.shape[0]
    blk = oft_block_size
    n_blocks = in_features // blk
    assert n_blocks * blk == in_features

    orig_shape = x.shape
    K, N = in_features, out_features
    M = 1
    for d in orig_shape[:-1]:
        M *= d
    x2 = x.reshape(M, K)
    out_dtype = W.dtype

    # ---- rotation placement (fold into W only when the main matmul dominates)
    if folded_weight is not None:
        wmat, x_in, w_is_nk = folded_weight, x2, False
    else:
        R = cayley_blocks_from_vec(oft_vec, blk)          # (r, blk, blk) fp32
        if M >= 4 * blk:
            wmat, x_in, w_is_nk = fold_rotation_into_weight(W, R, blk), x2, False
        else:
            wmat, x_in, w_is_nk = W, rotate_activations(x2, R, blk), True

    if x_in.dtype != wmat.dtype:
        x_in = x_in.astype(wmat.dtype)

    if bias is None:
        b2 = jnp.zeros((1, N), dtype=jnp.float32)
    else:
        b2 = bias.astype(jnp.float32).reshape(1, N)

    # ---- tiling (generation-aware VMEM budget)
    itx = jnp.dtype(x_in.dtype).itemsize
    itw = jnp.dtype(wmat.dtype).itemsize
    ito = jnp.dtype(out_dtype).itemsize
    vmem_cap = _vmem_capacity_bytes()                     # 128 MiB v5e/v6e, 64 MiB v7x
    budget = vmem_cap // 2
    small_m = M <= 64
    tm, tn, tk = _select_tiles(M, N, K, itx, itw, ito, budget, tile_m, small_m)

    # Ragged M handled by Pallas (partial last block), no pad / slice copies.
    grid = (pl.cdiv(M, tm), N // tn, K // tk)

    # Triple-buffer the streamed weight on the mem-bound small-M path when it
    # still has several weight tiles to stream (hides DMA-issue latency).
    w_buffers = 3 if (small_m and grid[1] * grid[2] >= 3) else 2
    w_block = (tn, tk) if w_is_nk else (tk, tn)
    w_index = (lambda i, j, k: (j, k)) if w_is_nk else (lambda i, j, k: (k, j))
    w_spec = pl.BlockSpec(w_block, w_index)
    if w_buffers > 2 and hasattr(pl, "Buffered"):
        try:
            w_spec = pl.BlockSpec(w_block, w_index,
                                  pipeline_mode=pl.Buffered(w_buffers))
        except TypeError:
            w_buffers = 2

    vmem_need = _estimate_vmem(tm, tn, tk, itx, itw, ito, w_buffers)
    vmem_limit = int(min(max(vmem_need + vmem_need // 4, 8 << 20),
                         (vmem_cap * 3) // 4))

    kernel = functools.partial(_matmul_bias_kernel, w_is_nk=w_is_nk)

    out = pl.pallas_call(
        kernel,
        out_shape=jax.ShapeDtypeStruct((M, N), out_dtype),
        grid=grid,
        in_specs=[
            pl.BlockSpec((tm, tk), lambda i, j, k: (i, k)),   # x tile
            w_spec,                                           # weight tile
            pl.BlockSpec((1, tn), lambda i, j, k: (0, j)),    # bias tile (fp32)
        ],
        out_specs=pl.BlockSpec((tm, tn), lambda i, j, k: (i, j)),
        scratch_shapes=[pltpu.VMEM((tm, tn), jnp.float32)],
        compiler_params=pltpu.CompilerParams(
            dimension_semantics=("parallel", "parallel", "arbitrary"),
            vmem_limit_bytes=vmem_limit),
    )(x_in, wmat, b2)

    return out.reshape(*orig_shape[:-1], N)


# ----------------------------------------------------------------------------
# Pure-JAX reference mirroring the original module path (rotate x, then linear).
# ----------------------------------------------------------------------------
def reference(x, oft_vec, W, bias, *, oft_block_size=32):
    blk = oft_block_size
    K = x.shape[-1]
    nb = K // blk
    R = cayley_blocks_from_vec(oft_vec, blk)
    xf = x.astype(jnp.float32)                               # cast to adapter dtype
    xb = xf.reshape(*x.shape[:-1], nb, blk)
    xr = jnp.einsum("...rk,rkc->...rc", xb, R).reshape(*x.shape)
    xr = xr.astype(x.dtype)                                  # cast back
    y = jnp.einsum("...k,nk->...n", xr.astype(jnp.float32), W.astype(jnp.float32))
    if bias is not None:
        y = y + bias.astype(jnp.float32)
    return y.astype(W.dtype)


if __name__ == "__main__":
    key = jax.random.PRNGKey(0)
    k1, k2, k3, k4, k5 = jax.random.split(key, 5)

    in_features, out_features = 1024, 768
    oft_block_size = 32
    r = in_features // oft_block_size
    n_elements = oft_block_size * (oft_block_size - 1) // 2

    oft_vec = 0.05 * jax.random.normal(k2, (r, n_elements), dtype=jnp.float32)
    W = (0.02 * jax.random.normal(k3, (out_features, in_features),
                                  dtype=jnp.float32)).astype(jnp.bfloat16)
    bias = (0.1 * jax.random.normal(k4, (out_features,), dtype=jnp.float32)
            ).astype(jnp.bfloat16)

    # Case 1: decode-sized ragged M=18 -> small-M fast path (rotate x, collapsed grid).
    x_small = jax.random.normal(k1, (2, 9, in_features), dtype=jnp.float32
                                ).astype(jnp.bfloat16)
    y1 = jax.block_until_ready(
        awq_oft_linear(x_small, oft_vec, W, bias, oft_block_size=oft_block_size))
    y1_ref = reference(x_small, oft_vec, W, bias, oft_block_size=oft_block_size)
    assert y1.shape == (2, 9, out_features) and y1.dtype == W.dtype
    assert jnp.allclose(y1.astype(jnp.float32), y1_ref.astype(jnp.float32),
                        atol=5e-2, rtol=5e-2), "small-M path mismatch vs reference"

    # Case 2: prefill-sized M=256 -> fold-into-weight path; bias=None (common for AWQ).
    x_big = jax.random.normal(k5, (2, 128, in_features), dtype=jnp.float32
                              ).astype(jnp.bfloat16)
    y2 = jax.block_until_ready(
        awq_oft_linear(x_big, oft_vec, W, None, oft_block_size=oft_block_size))
    y2_ref = reference(x_big, oft_vec, W, None, oft_block_size=oft_block_size)
    assert y2.shape == (2, 128, out_features) and y2.dtype == W.dtype
    assert jnp.allclose(y2.astype(jnp.float32), y2_ref.astype(jnp.float32),
                        atol=5e-2, rtol=5e-2), "fold path mismatch vs reference"

    print("KERNEL_OK")
</pallas_src>

<mosaic_0001>
module attributes {stable_mosaic.version = 11 : i64} {
  func.func @_matmul_bias_kernel(%arg0: i32, %arg1: i32, %arg2: i32, %arg3: memref<32x1024xbf16, #tpu.memory_space<vmem>>, %arg4: memref<384x1024xbf16, #tpu.memory_space<vmem>>, %arg5: memref<1x384xf32, #tpu.memory_space<vmem>>, %arg6: memref<32x384xbf16, #tpu.memory_space<vmem>>, %arg7: memref<32x384xf32, #tpu.memory_space<vmem>>) attributes {dimension_semantics = [#tpu.dimension_semantics<parallel>, #tpu.dimension_semantics<parallel>, #tpu.dimension_semantics<arbitrary>], iteration_bounds = array<i64: 1, 2, 1>, scalar_prefetch = 0 : i64, scratch_operands = 1 : i64, tpu.core_type = #tpu.core_type<tc>, window_params = [{transform_indices = @transform_0, window_bounds = array<i64: 32, 1024>}, {transform_indices = @transform_1, window_bounds = array<i64: 384, 1024>}, {transform_indices = @transform_2, window_bounds = array<i64: 1, 384>}, {transform_indices = @transform_3, window_bounds = array<i64: 32, 384>}]} {
    %c0_i32 = arith.constant 0 : i32
    %0 = arith.cmpi eq, %arg2, %c0_i32 : i32
    %1 = arith.extui %0 : i1 to i32
    %c0_i32_0 = arith.constant 0 : i32
    %2 = arith.cmpi ne, %1, %c0_i32_0 : i32
    scf.if %2 {
      %c0_10 = arith.constant 0 : index
      %c0_11 = arith.constant 0 : index
      %12 = vector.load %arg5[%c0_10, %c0_11] : memref<1x384xf32, #tpu.memory_space<vmem>>, vector<1x384xf32>
      %13 = vector.shape_cast %12 : vector<1x384xf32> to vector<1x384xf32>
      %14 = vector.broadcast %13 : vector<1x384xf32> to vector<32x384xf32>
      %c0_12 = arith.constant 0 : index
      %c0_13 = arith.constant 0 : index
      %15 = vector.load %arg7[%c0_12, %c0_13] : memref<32x384xf32, #tpu.memory_space<vmem>>, vector<32x384xf32>
      tpu.vector_store %arg7[%c0_12, %c0_13], %14 {strides = array<i32>} : memref<32x384xf32, #tpu.memory_space<vmem>>, vector<32x384xf32>,
    } else {
    }
    %c0 = arith.constant 0 : index
    %c0_1 = arith.constant 0 : index
    %3 = vector.load %arg7[%c0, %c0_1] : memref<32x384xf32, #tpu.memory_space<vmem>>, vector<32x384xf32>
    %c0_2 = arith.constant 0 : index
    %c0_3 = arith.constant 0 : index
    %4 = vector.load %arg3[%c0_2, %c0_3] : memref<32x1024xbf16, #tpu.memory_space<vmem>>, vector<32x1024xbf16>
    %c0_4 = arith.constant 0 : index
    %c0_5 = arith.constant 0 : index
    %5 = vector.load %arg4[%c0_4, %c0_5] : memref<384x1024xbf16, #tpu.memory_space<vmem>>, vector<384x1024xbf16>
    %cst = arith.constant dense<0.000000e+00> : vector<32x384xf32>
    %6 = tpu.matmul %4, %5, %cst {dimension_numbers = #tpu.dot_dimension_numbers<[1], [1], [0], [0], [0, 0, 1, 0], [], []>} : vector<32x1024xbf16>, vector<384x1024xbf16>, vector<32x384xf32> -> vector<32x384xf32>
    %7 = arith.addf %3, %6 : vector<32x384xf32>
    %c0_6 = arith.constant 0 : index
    %c0_7 = arith.constant 0 : index
    %8 = vector.load %arg7[%c0_6, %c0_7] : memref<32x384xf32, #tpu.memory_space<vmem>>, vector<32x384xf32>
    tpu.vector_store %arg7[%c0_6, %c0_7], %7 {strides = array<i32>} : memref<32x384xf32, #tpu.memory_space<vmem>>, vector<32x384xf32>,
    %c0_i32_8 = arith.constant 0 : i32
    %9 = arith.cmpi eq, %arg2, %c0_i32_8 : i32
    %10 = arith.extui %9 : i1 to i32
    %c0_i32_9 = arith.constant 0 : i32
    %11 = arith.cmpi ne, %10, %c0_i32_9 : i32
    scf.if %11 {
      %c0_10 = arith.constant 0 : index
      %c0_11 = arith.constant 0 : index
      %12 = vector.load %arg7[%c0_10, %c0_11] : memref<32x384xf32, #tpu.memory_space<vmem>>, vector<32x384xf32>
      %13 = arith.truncf %12 : vector<32x384xf32> to vector<32x384xbf16>
      %c0_12 = arith.constant 0 : index
      %c0_13 = arith.constant 0 : index
      %14 = vector.load %arg6[%c0_12, %c0_13] : memref<32x384xbf16, #tpu.memory_space<vmem>>, vector<32x384xbf16>
      tpu.vector_store %arg6[%c0_12, %c0_13], %13 {strides = array<i32>} : memref<32x384xbf16, #tpu.memory_space<vmem>>, vector<32x384xbf16>,
    } else {
    }
    return
  }
  func.func @transform_0(%arg0: i32, %arg1: i32, %arg2: i32) -> (i32, i32) {
    %c0_i32 = arith.constant 0 : i32
    return %arg0, %arg2 : i32, i32
  }
  func.func @transform_1(%arg0: i32, %arg1: i32, %arg2: i32) -> (i32, i32) {
    %c0_i32 = arith.constant 0 : i32
    return %arg1, %arg2 : i32, i32
  }
  func.func @transform_2(%arg0: i32, %arg1: i32, %arg2: i32) -> (i32, i32) {
    %c0_i32 = arith.constant 0 : i32
    %c0_i32_0 = arith.constant 0 : i32
    return %c0_i32, %arg1 : i32, i32
  }
  func.func @transform_3(%arg0: i32, %arg1: i32, %arg2: i32) -> (i32, i32) {
    %c0_i32 = arith.constant 0 : i32
    return %arg0, %arg1 : i32, i32
  }
}

</mosaic_0001>

<bundles_post_ra>
// kernel: tpu_custom_call.1
= control target key start
LH: loop header
LB: loop body
LE: loop exit
PB: predicated region body
PF: predicated region fallthrough
CT: control target
= control target key end

     0   :  { %s3197_s0 = inlined_call_operand.hbm [shape: bf16[18,1024], index: 0, kind: input, shape index: {}]   ;;  %s3198_s1 = inlined_call_operand.hbm [shape: bf16[768,1024], index: 1, kind: input, shape index: {}]   ;;  %s3199_s2 = inlined_call_operand.hbm [shape: f32[1,768], index: 2, kind: input, shape index: {}]   ;;  %s3200_s3 = inlined_call_operand.hbm [shape: bf16[18,768], index: 3, kind: output, shape index: {}]  }
   0x1   :  { %3202 = sst [smem:[#allocation14_spill]] %s3197_s0 }
   0x2   :  { %3203 = sst [smem:[#allocation15_spill]] %s3198_s1 }
   0x3   :  { %8 = vsyncpa [#allocation4], 0 }
   0x4   :  { %9 = vsyncpa [#allocation7], 0 }
   0x5   :  { %11 = vsyncpa [#allocation7 + $0x1], 0 }
   0x6   :  { %12 = vsyncpa [#allocation5], 0 }
   0x7   :  { %14 = vsyncpa [#allocation5 + $0x1], 0  ;;  %s2747_s12 = smov 0   ;;  %s2749_s13 = smov 0  }
   0x8   :  { %s2751_s14 = smov 0   ;;  %s2753_s15 = smov 0  }
   0x9   :  { %s2755_s16 = smov 0   ;;  %s2757_s17 = smov 0  }
   0xa LB: > { %s2778_s18 = sadd.s32 4294967295, %s2714_s17   ;;  %s2235_s19 = sadd.s32 4294967294, %s2714_s17   ;;  %s2714_s17 = sphi %s2757_s17, %s20_s17   ;;  %s2710_s16 = sphi %s2755_s16, %s3219_s16   ;;  %s2706_s15 = sphi %s2753_s15, %s3218_s15   ;;  %s2702_s14 = sphi %s2751_s14, %s3217_s14   ;;  %s2698_s13 = sphi %s2749_s13, %s3216_s13   ;;  %s2694_s12 = sphi %s2747_s12, %s3215_s12  }
   0xb   : > { %s35_s20 = sadd.s32 1, %s2710_s16  ;;  %s76_s21 = sadd.s32 1, %s2702_s14 }
   0xc   : > { %p37_p0 = scmp.ge.s32.totalorder %s35_s20, 2  ;;  %p83_p1 = scmp.ne.s32.totalorder %s2702_s14, %s2698_s13 }
   0xd   : > { %p84_p2 = scmp.eq.s32.totalorder %s2714_s17, 0  ;;  %p89_p3 = scmp.ne.s32.totalorder %s2698_s13, %s2694_s12 }
   0xe   : > { %s3221_s20 = smov (%p37_p0, %s35_s20), 0  ;;  %p90_p5 = scmp.eq.s32.totalorder %s2778_s18, 0 }
   0xf   : > { %3204 = sst [smem:[#allocation13_spill]] %s3221_s20  ;;  %p2790_p4 = por %p84_p2, %p83_p1 }
  0x10   : > { %s71_s23 = ssub.s32 %s2710_s16, %s3221_s20  ;;  %p141_p6 = scmp.eq.s32.totalorder %s2778_s18, 1 }
  0x11   : > { %p74_p7 = scmp.eq.s32.totalorder %s71_s23, 0  ;;  %p2800_p8 = por %p90_p5, %p89_p3 }
  0x12   : > { %p2804_p9 = por %p141_p6, %p83_p1  ;;  %p147_p10 = scmp.eq.s32.totalorder %s2235_s19, 1 }
  0x13   : > { %s2809_s26 = scalar_select %p74_p7, %s2702_s14, %s76_s21  }
  0x14   : > { %p2811_p11 = por %p147_p10, %p89_p3  ;;  %p2236_p12 = scmp.ge.s32.totalorder %s2714_s17, 1 }
  0x15   : > { %p154_p13 = scmp.lt.s32.totalorder %s2714_s17, 3 }
  0x17   : > { %p2817_p0 = pnand %p2236_p12, %p154_p13 }
  0x18   : > { %p2237_p1 = scmp.ne.s32.totalorder (!%p2817_p0), %s2778_s18, 0 }
  0x19   : > { %158 = sbr.rel (%p2817_p0) target bundleno = 54 (0x36), region = 12 }
  0x1e   : > { %162 = sbr.rel (%p2237_p1) target bundleno = 54 (0x36), region = 16 }
  0x23   : > { %170 = vsyncadd [#allocation4], 512  ;;  %s2716_s29 = smov [#allocation3]  }
  0x24   : > { %s177_s30 = sshll.u32 %s2716_s29, 4  ;;  %s178_s30 = int_to_ptr.vmem [resolvable:$true] %s177_s30 }
  0x25   : > { %s2566_s4 = scalar_lea.vmem %s178_s30, 1536  ;;  %s2570_s5 = scalar_lea.vmem %s178_s30, 2048 }
  0x26   : > { %p2567_p2 = scmp.ne.s32.totalorder %s178_s30, %s2566_s4  ;;  %p2571_p3 = scmp.lt.s32.totalorder %s178_s30, %s178_s30 }
  0x27   : > { %p2572_p6 = scmp.lt.s32.totalorder %s2570_s5, %s2566_s4 }
  0x29   : > { %p2573_p7 = por %p2572_p6, %p2571_p3 }
  0x2b   : > { %p2574_p10 = pnand %p2573_p7, %p2567_p2 }
  0x2d   : > { %2577 = shalt.err (!%p2574_p10)
}
  0x2e   : > { %s2717_s6 = smov 512   ;;  %s2718_s7 = smov 32  }
  0x2f   : > { %s3210_s0 = sld [smem:[#allocation14_spill]] }
  0x35   : > { %183 = dma.hbm_to_vmem [thread:$0]  %s3210_s0, 1536, %s178_s30, [#allocation4], %s2717_s6, %s2717_s6, %s2718_s7  }
  0x36 PF: > { %p2499_p13 = scmp.lt.s32.totalorder %s2714_s17, 2  ;;  %s191_s10 = sand.u32 1, %s2714_s17  }
  0x37   : > { %s193_s11 = sand.u32 1, %s2702_s14   ;;  %s2475_s21 = smul.u32 24576, %s2710_s16 }
  0x38   : > { %s2476_s19 = smul.u32 1536, %s193_s11  ;;  %p2834_p1 = pnand %p2499_p13, %p2790_p4 }
  0x39   : > { %s3212_s1 = sld [smem:[#allocation15_spill]]  ;;  %s2477_s7 = smul.u32 3, %s193_s11 }
  0x3a   : > { %s195_s5 = scalar_lea.vmem [#allocation6], %s2476_s19  ;;  %s2841_s8 = scalar_lea.sflag [#allocation7], %s191_s10 }
  0x3b   : > { %s205_s6 = sshll.u32 %s195_s5, 4  ;;  %p2580_p2 = pneg %p2834_p1  ;;  %s206_s6 = int_to_ptr.vmem [resolvable:$true] %s205_s6 }
  0x3c   : > { %s2591_s9 = scalar_lea.vmem %s206_s6, 24576  ;;  %s2719_s22 = smov [#allocation6]  }
  0x3d   : > { %p2592_p3 = scmp.ne.s32.totalorder %s206_s6, %s2591_s9  ;;  %s2596_s0 = sshll.u32 %s2719_s22, 4  ;;  %s2597_s0 = int_to_ptr.vmem [resolvable:$false] %s2596_s0 }
  0x3e   : > { %s2598_s29 = scalar_lea.vmem %s2597_s0, 49152  ;;  %p2599_p7 = scmp.lt.s32.totalorder %s206_s6, %s2597_s0 }
  0x3f   : > { %s204_s4 = scalar_lea.hbm %s3212_s1, %s2475_s21  ;;  %p2594_p4 = pnand %p2592_p3, %p2580_p2 }
  0x40   : > { %p2600_p10 = scmp.lt.s32.totalorder %s2598_s29, %s2591_s9 }
  0x41   : > { %p2595_p6 = pneg %p2594_p4 }
  0x42   : > { %p2601_p13 = por %p2600_p10, %p2599_p7 }
  0x44   : > { %p2602_p12 = pnand %p2601_p13, %p2595_p6 }
  0x46   : > { %2605 = shalt.err (!%p2602_p12)
}
  0x47   : > { %s2720_s11 = smov 512   ;;  %s2721_s10 = smov 32  }
  0x48   : > { %2491 = dma.hbm_to_vmem [thread:$0]  (!%p2834_p1), %s204_s4, 24576, %s206_s6, %s2841_s8, %s2720_s11, %s2720_s11, %s2721_s10  }
  0x49   : > { %s2465_s19 = smul.u32 48, %s2710_s16  ;;  %s219_s21 = scalar_lea.vmem [#allocation8], %s2477_s7 }
  0x4a   : > { %s227_s30 = sshll.u32 %s219_s21, 4  ;;  %s2722_s9 = smov [#allocation8]   ;;  %s228_s30 = int_to_ptr.vmem [resolvable:$true] %s227_s30 }
  0x4b   : > { %s225_s1 = scalar_lea.hbm %s3199_s2, %s2465_s19  ;;  %s2619_s0 = scalar_lea.vmem %s228_s30, 48 }
  0x4c   : > { %p2620_p3 = scmp.ne.s32.totalorder %s228_s30, %s2619_s0  ;;  %s2624_s29 = sshll.u32 %s2722_s9, 4  ;;  %s2625_s29 = int_to_ptr.vmem [resolvable:$false] %s2624_s29 }
  0x4d   : > { %s2626_s20 = scalar_lea.vmem %s2625_s29, 96  ;;  %p2627_p6 = scmp.lt.s32.totalorder %s228_s30, %s2625_s29 }
  0x4e   : > { %p2622_p12 = pnand %p2620_p3, %p2580_p2  ;;  %p2628_p7 = scmp.lt.s32.totalorder %s2626_s20, %s2619_s0 }
  0x50   : > { %p2623_p4 = pneg %p2622_p12  ;;  %p2629_p10 = por %p2628_p7, %p2627_p6 }
  0x52   : > { %p2630_p13 = pnand %p2629_p10, %p2623_p4 }
  0x54   : > { %2633 = shalt.err (!%p2630_p13)
}
  0x55   : > { %2494 = dma.hbm_to_vmem [thread:$0]  (!%p2834_p1), %s225_s1, 48, %s228_s30, %s2841_s8  }
  0x56   : > { %236 = sbr.rel (%p2817_p0) target bundleno = 723 (0x2d3), region = 32 }
  0x5b   : > { %2681 = dma.done.wait (%p90_p5), [#allocation4], 2048  }
  0x5c   : > { %2683 = vsyncadd (%p90_p5), [#allocation4], 4294965248  ;;  %s242_s20 = sand.u32 1, %s2778_s18   ;;  %s2869_s4 = sand.u32 1, %s2698_s13  }
  0x5d   : > { %s2478_s6 = smul.u32 1536, %s2869_s4  ;;  %s243_s23 = scalar_lea.sflag [#allocation7], %s242_s20 }
  0x5f   : > { %s2872_s7 = scalar_lea.vmem [#allocation6], %s2478_s6 }
  0x60   : > { %2685 = dma.done.wait (%p2800_p8), %s243_s23, 24624  }
  0x61   : > { %2687 = vsyncadd (%p2800_p8), %s243_s23, 4294942672  ;;  %v414_v0 = vld [vmem:[%s2872_s7 + $0x1c0] sm:$0xff]  ;;  %v415_v2 = vld [vmem:[%s2872_s7 + $0x1c8] sm:$0xff]  ;;  %s2479_s1 = smul.u32 3, %s2869_s4  ;;  %s2086_s8 = scalar_lea.sflag [#allocation5], %s2869_s4 }
  0x62   : > { %v418_v1 = vld [vmem:[%s2872_s7 + $0x1e0] sm:$0xff]  ;;  %v419_v4 = vld [vmem:[%s2872_s7 + $0x1e8] sm:$0xff]  ;;  %s2480_s24 = smul.u32 48, %s2869_s4 }
  0x63   : > { %v2317_v3 = vcombine.high %v414_v0, %v418_v1  ;;  %v2316_v5 = vcombine.low %v414_v0, %v418_v1  ;;  %v406_v6 = vld [vmem:[%s2872_s7 + $0x180] sm:$0xff]  ;;  %v2319_v8 = vcombine.high %v415_v2, %v419_v4  ;;  %v2318_v9 = vcombine.low %v415_v2, %v419_v4  ;;  %v407_v11 = vld [vmem:[%s2872_s7 + $0x188] sm:$0xff]  ;;  %s255_s18 = scalar_lea.vmem [#allocation8], %s2479_s1 }
  0x64   : > { %v410_v7 = vld [vmem:[%s2872_s7 + $0x1a0] sm:$0xff]  ;;  %v411_v12 = vld [vmem:[%s2872_s7 + $0x1a8] sm:$0xff]  ;;  %s3144_s28 = scalar_lea.vmem [#allocation9], %s2480_s24 }
  0x65   : > { %v2309_v10 = vcombine.high %v406_v6, %v410_v7  ;;  %1590 = vmatprep.subr.bf16.mxu0 %v2317_v3  ;;  %v2311_v13 = vcombine.high %v407_v11, %v411_v12  ;;  %1643 = vmatprep.subr.bf16.mxu1 %v2319_v8  ;;  %v398_v14 = vld [vmem:[%s2872_s7 + $0x140] sm:$0xff]  ;;  %v399_v16 = vld [vmem:[%s2872_s7 + $0x148] sm:$0xff]  ;;  %v2308_v18 = vcombine.low %v406_v6, %v410_v7 }
  0x66   : > { %1591 = vmatpush1.bf16.xpose.msra.mxu0 %v2316_v5  ;;  %1644 = vmatpush1.bf16.xpose.msra.mxu1 %v2318_v9  ;;  %v402_v15 = vld [vmem:[%s2872_s7 + $0x160] sm:$0xff]  ;;  %v403_v17 = vld [vmem:[%s2872_s7 + $0x168] sm:$0xff]  ;;  %v2310_v19 = vcombine.low %v407_v11, %v411_v12 }
  0x67   : > { %1592 = vmatprep.subr.bf16.mxu0 %v2309_v10  ;;  %1645 = vmatprep.subr.bf16.mxu1 %v2311_v13  ;;  %v2301_v20 = vcombine.high %v398_v14, %v402_v15  ;;  %v2303_v21 = vcombine.high %v399_v16, %v403_v17  ;;  %v390_v22 = vld [vmem:[%s2872_s7 + $0x100] sm:$0xff]  ;;  %v391_v24 = vld [vmem:[%s2872_s7 + $0x108] sm:$0xff]  ;;  %v2300_v26 = vcombine.low %v398_v14, %v402_v15 }
  0x68   : > { %v394_v23 = vld [vmem:[%s2872_s7 + $0x120] sm:$0xff]  ;;  %v395_v25 = vld [vmem:[%s2872_s7 + $0x128] sm:$0xff]  ;;  %v2302_v27 = vcombine.low %v399_v16, %v403_v17 }
  0x69   : > { %v2293_v28 = vcombine.high %v390_v22, %v394_v23  ;;  %v2295_v29 = vcombine.high %v391_v24, %v395_v25  ;;  %v382_v30 = vld [vmem:[%s2872_s7 + $0xc0] sm:$0xff]  ;;  %v343_v36 = vld [vmem:[#allocation3 + $0x8] sm:$0xff]  ;;  %v2292_v42 = vcombine.low %v390_v22, %v394_v23  ;;  %v2294_v43 = vcombine.low %v391_v24, %v395_v25 }
  0x6a   : > { %v342_v31 = vld [vmem:[#allocation3] sm:$0xff]  ;;  %v347_v37 = vld [vmem:[#allocation3 + $0x28] sm:$0xff] }
  0x6b   : > { %v346_v32 = vld [vmem:[#allocation3 + $0x20] sm:$0xff]  ;;  %v383_v38 = vld [vmem:[%s2872_s7 + $0xc8] sm:$0xff]  ;;  %v2902_v40 = vcombine.low %v343_v36, %v347_v37  ;;  %v2904_v41 = vcombine.high %v343_v36, %v347_v37 }
  0x6c   : > { %v386_v33 = vld [vmem:[%s2872_s7 + $0xe0] sm:$0xff]  ;;  %v2896_v34 = vcombine.low %v342_v31, %v346_v32  ;;  %v2898_v35 = vcombine.high %v342_v31, %v346_v32  ;;  %v387_v39 = vld [vmem:[%s2872_s7 + $0xe8] sm:$0xff] }
  0x6d   : > { %v2285_v44 = vcombine.high %v382_v30, %v386_v33  ;;  %1675 = vmatprep.mubr.bf16.mxu1 %v2904_v41  ;;  %v2287_v45 = vcombine.high %v383_v38, %v387_v39  ;;  %v374_v46 = vld [vmem:[%s2872_s7 + $0x80] sm:$0xff]  ;;  %v375_v48 = vld [vmem:[%s2872_s7 + $0x88] sm:$0xff]  ;;  %v2284_v50 = vcombine.low %v382_v30, %v386_v33  ;;  %v2286_v51 = vcombine.low %v383_v38, %v387_v39 }
  0x6e   : > { %1593 = vmatpush1.bf16.xpose.msra.mxu0 %v2308_v18  ;;  %1646 = vmatpush1.bf16.xpose.msra.mxu1 %v2310_v19  ;;  %v378_v47 = vld [vmem:[%s2872_s7 + $0xa0] sm:$0xff]  ;;  %v379_v49 = vld [vmem:[%s2872_s7 + $0xa8] sm:$0xff] }
  0x6f   : > { %1594 = vmatprep.subr.bf16.mxu0 %v2301_v20  ;;  %1647 = vmatprep.subr.bf16.mxu1 %v2303_v21  ;;  %v2277_v52 = vcombine.high %v374_v46, %v378_v47  ;;  %v2279_v53 = vcombine.high %v375_v48, %v379_v49  ;;  %v366_v54 = vld [vmem:[%s2872_s7 + $0x40] sm:$0xff]  ;;  %v367_v56 = vld [vmem:[%s2872_s7 + $0x48] sm:$0xff]  ;;  %v2276_v58 = vcombine.low %v374_v46, %v378_v47 }
  0x70   : > { %1622 = vmatprep.mubr.bf16.mxu0 %v2898_v35  ;;  %v370_v55 = vld [vmem:[%s2872_s7 + $0x60] sm:$0xff]  ;;  %v371_v57 = vld [vmem:[%s2872_s7 + $0x68] sm:$0xff]  ;;  %v2278_v59 = vcombine.low %v375_v48, %v379_v49 }
  0x71   : > { %v2269_v60 = vcombine.high %v366_v54, %v370_v55  ;;  %v2271_v61 = vcombine.high %v367_v56, %v371_v57  ;;  %v358_v62 = vld [vmem:[%s2872_s7] sm:$0xff]  ;;  %v359_v0 = vld [vmem:[%s2872_s7 + $0x8] sm:$0xff]  ;;  %v2268_v2 = vcombine.low %v366_v54, %v370_v55  ;;  %v2270_v3 = vcombine.low %v367_v56, %v371_v57 }
  0x72   : > { %v362_v63 = vld [vmem:[%s2872_s7 + $0x20] sm:$0xff]  ;;  %v363_v1 = vld [vmem:[%s2872_s7 + $0x28] sm:$0xff] }
  0x73   : > { %v2261_v4 = vcombine.high %v358_v62, %v362_v63  ;;  %v2263_v5 = vcombine.high %v359_v0, %v363_v1  ;;  %v478_v6 = vld [vmem:[%s2872_s7 + $0x3c0] sm:$0xff]  ;;  %v479_v8 = vld [vmem:[%s2872_s7 + $0x3c8] sm:$0xff]  ;;  %v2260_v10 = vcombine.low %v358_v62, %v362_v63  ;;  %v2262_v11 = vcombine.low %v359_v0, %v363_v1 }
  0x74   : > { %v482_v7 = vld [vmem:[%s2872_s7 + $0x3e0] sm:$0xff]  ;;  %v483_v9 = vld [vmem:[%s2872_s7 + $0x3e8] sm:$0xff] }
  0x75   : > { %v2381_v12 = vcombine.high %v478_v6, %v482_v7  ;;  %v2383_v13 = vcombine.high %v479_v8, %v483_v9  ;;  %v470_v14 = vld [vmem:[%s2872_s7 + $0x380] sm:$0xff]  ;;  %v471_v16 = vld [vmem:[%s2872_s7 + $0x388] sm:$0xff]  ;;  %v2380_v18 = vcombine.low %v478_v6, %v482_v7  ;;  %v2382_v19 = vcombine.low %v479_v8, %v483_v9 }
  0x76   : > { %1595 = vmatpush1.bf16.xpose.msra.mxu0 %v2300_v26  ;;  %1648 = vmatpush1.bf16.xpose.msra.mxu1 %v2302_v27  ;;  %v474_v15 = vld [vmem:[%s2872_s7 + $0x3a0] sm:$0xff]  ;;  %v475_v17 = vld [vmem:[%s2872_s7 + $0x3a8] sm:$0xff] }
  0x77   : > { %1596 = vmatprep.subr.bf16.mxu0 %v2293_v28  ;;  %1649 = vmatprep.subr.bf16.mxu1 %v2295_v29  ;;  %v2373_v20 = vcombine.high %v470_v14, %v474_v15  ;;  %v2375_v21 = vcombine.high %v471_v16, %v475_v17  ;;  %v462_v22 = vld [vmem:[%s2872_s7 + $0x340] sm:$0xff]  ;;  %v463_v24 = vld [vmem:[%s2872_s7 + $0x348] sm:$0xff]  ;;  %v2372_v26 = vcombine.low %v470_v14, %v474_v15 }
  0x78   : > { %v466_v23 = vld [vmem:[%s2872_s7 + $0x360] sm:$0xff]  ;;  %v467_v25 = vld [vmem:[%s2872_s7 + $0x368] sm:$0xff]  ;;  %v2374_v27 = vcombine.low %v471_v16, %v475_v17 }
  0x79   : > { %v2365_v28 = vcombine.high %v462_v22, %v466_v23  ;;  %v2367_v29 = vcombine.high %v463_v24, %v467_v25  ;;  %v454_v30 = vld [vmem:[%s2872_s7 + $0x300] sm:$0xff]  ;;  %v455_v32 = vld [vmem:[%s2872_s7 + $0x308] sm:$0xff]  ;;  %v2364_v36 = vcombine.low %v462_v22, %v466_v23  ;;  %v2366_v37 = vcombine.low %v463_v24, %v467_v25  ;;  %v412_v22 = vld [vmem:[%s2872_s7 + $0x1b0] sm:$0xff] }
  0x7a   : > { %v458_v31 = vld [vmem:[%s2872_s7 + $0x320] sm:$0xff]  ;;  %v459_v33 = vld [vmem:[%s2872_s7 + $0x328] sm:$0xff]  ;;  %v409_v23 = vld [vmem:[%s2872_s7 + $0x198] sm:$0xff] }
  0x7b   : > { %v2357_v38 = vcombine.high %v454_v30, %v458_v31  ;;  %v2359_v39 = vcombine.high %v455_v32, %v459_v33  ;;  %v2356_v46 = vcombine.low %v454_v30, %v458_v31  ;;  %v2358_v47 = vcombine.low %v455_v32, %v459_v33  ;;  %v349_v25 = vld [vmem:[#allocation3 + $0x38] sm:$0xff]  ;;  %v351_v31 = vld [vmem:[#allocation3 + $0x48] sm:$0xff] }
  0x7c   : > { %v355_v32 = vld [vmem:[#allocation3 + $0x68] sm:$0xff] }
  0x7e   : > { %1597 = vmatpush1.bf16.xpose.msra.mxu0 %v2292_v42  ;;  %1650 = vmatpush1.bf16.xpose.msra.mxu1 %v2294_v43  ;;  %v446_v42 = vld [vmem:[%s2872_s7 + $0x2c0] sm:$0xff] }
  0x7f   : > { %1598 = vmatprep.subr.bf16.mxu0 %v2285_v44  ;;  %1651 = vmatprep.subr.bf16.mxu1 %v2287_v45  ;;  %v450_v43 = vld [vmem:[%s2872_s7 + $0x2e0] sm:$0xff]  ;;  %v447_v44 = vld [vmem:[%s2872_s7 + $0x2c8] sm:$0xff] }
  0x80   : > { %v451_v45 = vld [vmem:[%s2872_s7 + $0x2e8] sm:$0xff]  ;;  %v2349_v48 = vcombine.high %v446_v42, %v450_v43  ;;  %v2348_v54 = vcombine.low %v446_v42, %v450_v43  ;;  %v400_v42 = vld [vmem:[%s2872_s7 + $0x150] sm:$0xff] }
  0x81   : > { %v2351_v49 = vcombine.high %v447_v44, %v451_v45  ;;  %v2350_v55 = vcombine.low %v447_v44, %v451_v45  ;;  %v404_v43 = vld [vmem:[%s2872_s7 + $0x170] sm:$0xff]  ;;  %v401_v44 = vld [vmem:[%s2872_s7 + $0x158] sm:$0xff] }
  0x82   : > { %v405_v45 = vld [vmem:[%s2872_s7 + $0x178] sm:$0xff] }
  0x86   : > { %1599 = vmatpush1.bf16.xpose.msra.mxu0 %v2284_v50  ;;  %1652 = vmatpush1.bf16.xpose.msra.mxu1 %v2286_v51  ;;  %v438_v50 = vld [vmem:[%s2872_s7 + $0x280] sm:$0xff] }
  0x87   : > { %1600 = vmatprep.subr.bf16.mxu0 %v2277_v52  ;;  %1653 = vmatprep.subr.bf16.mxu1 %v2279_v53  ;;  %v442_v51 = vld [vmem:[%s2872_s7 + $0x2a0] sm:$0xff]  ;;  %v439_v52 = vld [vmem:[%s2872_s7 + $0x288] sm:$0xff] }
  0x88   : > { %v443_v53 = vld [vmem:[%s2872_s7 + $0x2a8] sm:$0xff]  ;;  %v2341_v56 = vcombine.high %v438_v50, %v442_v51  ;;  %v2340_v62 = vcombine.low %v438_v50, %v442_v51  ;;  %v2305_v50 = vcombine.high %v400_v42, %v404_v43  ;;  %v2307_v51 = vcombine.high %v401_v44, %v405_v45 }
  0x89   : > { %v2343_v57 = vcombine.high %v439_v52, %v443_v53  ;;  %v2342_v63 = vcombine.low %v439_v52, %v443_v53 }
  0x8e   : > { %1601 = vmatpush1.bf16.xpose.msra.mxu0 %v2276_v58  ;;  %1654 = vmatpush1.bf16.xpose.msra.mxu1 %v2278_v59  ;;  %v430_v58 = vld [vmem:[%s2872_s7 + $0x240] sm:$0xff] }
  0x8f   : > { %1602 = vmatprep.subr.bf16.mxu0 %v2269_v60  ;;  %1655 = vmatprep.subr.bf16.mxu1 %v2271_v61  ;;  %v434_v59 = vld [vmem:[%s2872_s7 + $0x260] sm:$0xff]  ;;  %v431_v60 = vld [vmem:[%s2872_s7 + $0x248] sm:$0xff] }
  0x90   : > { %v435_v61 = vld [vmem:[%s2872_s7 + $0x268] sm:$0xff]  ;;  %v2333_v0 = vcombine.high %v430_v58, %v434_v59  ;;  %v2332_v6 = vcombine.low %v430_v58, %v434_v59  ;;  %v2304_v58 = vcombine.low %v400_v42, %v404_v43  ;;  %v2306_v59 = vcombine.low %v401_v44, %v405_v45 }
  0x91   : > { %v2335_v1 = vcombine.high %v431_v60, %v435_v61  ;;  %v2334_v7 = vcombine.low %v431_v60, %v435_v61 }
  0x96   : > { %1603 = vmatpush1.bf16.xpose.msra.mxu0 %v2268_v2  ;;  %1656 = vmatpush1.bf16.xpose.msra.mxu1 %v2270_v3  ;;  %v422_v2 = vld [vmem:[%s2872_s7 + $0x200] sm:$0xff] }
  0x97   : > { %1604 = vmatprep.subr.bf16.mxu0 %v2261_v4  ;;  %1657 = vmatprep.subr.bf16.mxu1 %v2263_v5  ;;  %v426_v3 = vld [vmem:[%s2872_s7 + $0x220] sm:$0xff]  ;;  %v423_v4 = vld [vmem:[%s2872_s7 + $0x208] sm:$0xff] }
  0x98   : > { %v427_v5 = vld [vmem:[%s2872_s7 + $0x228] sm:$0xff]  ;;  %v2325_v8 = vcombine.high %v422_v2, %v426_v3  ;;  %v2324_v14 = vcombine.low %v422_v2, %v426_v3 }
  0x99   : > { %v2327_v9 = vcombine.high %v423_v4, %v427_v5  ;;  %v2326_v15 = vcombine.low %v423_v4, %v427_v5 }
  0x9e   : > { %1605 = vmatpush1.bf16.xpose.msra.mxu0 %v2260_v10  ;;  %1658 = vmatpush1.bf16.xpose.msra.mxu1 %v2262_v11  ;;  %v416_v10 = vld [vmem:[%s2872_s7 + $0x1d0] sm:$0xff] }
  0x9f   : > { %1606 = vmatprep.subr.bf16.mxu0 %v2381_v12  ;;  %1659 = vmatprep.subr.bf16.mxu1 %v2383_v13  ;;  %v420_v11 = vld [vmem:[%s2872_s7 + $0x1f0] sm:$0xff]  ;;  %v417_v12 = vld [vmem:[%s2872_s7 + $0x1d8] sm:$0xff] }
  0xa0   : > { %v421_v13 = vld [vmem:[%s2872_s7 + $0x1f8] sm:$0xff]  ;;  %v2321_v16 = vcombine.high %v416_v10, %v420_v11  ;;  %v2320_v30 = vcombine.low %v416_v10, %v420_v11 }
  0xa1   : > { %v2323_v17 = vcombine.high %v417_v12, %v421_v13  ;;  %v2322_v33 = vcombine.low %v417_v12, %v421_v13 }
  0xa6   : > { %1607 = vmatpush2.bf16.xpose.msra.mxu0 %v2380_v18  ;;  %1660 = vmatpush2.bf16.xpose.msra.mxu1 %v2382_v19  ;;  %v408_v18 = vld [vmem:[%s2872_s7 + $0x190] sm:$0xff] }
  0xa7   : > { %1608 = vmatprep.subr.bf16.mxu0 %v2373_v20  ;;  %1661 = vmatprep.subr.bf16.mxu1 %v2375_v21  ;;  %v344_v19 = vld [vmem:[#allocation3 + $0x10] sm:$0xff]  ;;  %v345_v21 = vld [vmem:[#allocation3 + $0x18] sm:$0xff] }
  0xa8   : > { %v348_v20 = vld [vmem:[#allocation3 + $0x30] sm:$0xff]  ;;  %v2983_v53 = vcombine.high %v345_v21, %v349_v25 }
  0xa9   : > { %v2959_v24 = vcombine.low %v344_v19, %v348_v20  ;;  %v2980_v52 = vcombine.high %v344_v19, %v348_v20 }
  0xae   : > { %1609 = vmatpush2.bf16.xpose.msra.mxu0 %v2372_v26  ;;  %1662 = vmatpush2.bf16.xpose.msra.mxu1 %v2374_v27  ;;  %v413_v26 = vld [vmem:[%s2872_s7 + $0x1b8] sm:$0xff]  ;;  %v350_v27 = vld [vmem:[#allocation3 + $0x40] sm:$0xff] }
  0xaf   : > { %1610 = vmatprep.subr.bf16.mxu0 %v2365_v28  ;;  %1663 = vmatprep.subr.bf16.mxu1 %v2367_v29  ;;  %v354_v28 = vld [vmem:[#allocation3 + $0x60] sm:$0xff]  ;;  %v2962_v29 = vcombine.low %v345_v21, %v349_v25  ;;  %v361_v25 = vld [vmem:[%s2872_s7 + $0x18] sm:$0xff] }
  0xb6   : > { %1611 = vmatpush2.bf16.xpose.msra.mxu0 %v2364_v36  ;;  %1664 = vmatpush2.bf16.xpose.msra.mxu1 %v2366_v37  ;;  %v2313_v36 = vcombine.high %v408_v18, %v412_v22  ;;  %v2315_v37 = vcombine.high %v409_v23, %v413_v26 }
  0xb7   : > { %1612 = vmatprep.subr.bf16.mxu0 %v2357_v38  ;;  %1665 = vmatprep.subr.bf16.mxu1 %v2359_v39  ;;  %v2964_v38 = vcombine.high %v350_v27, %v354_v28  ;;  %v2967_v39 = vcombine.high %v351_v31, %v355_v32 }
  0xbe   : > { %1613 = vmatpush2.bf16.xpose.msra.mxu0 %v2356_v46  ;;  %1666 = vmatpush2.bf16.xpose.msra.mxu1 %v2358_v47  ;;  %v2976_v46 = vcombine.low %v350_v27, %v354_v28  ;;  %v2312_v47 = vcombine.low %v408_v18, %v412_v22  ;;  %v360_v22 = vld [vmem:[%s2872_s7 + $0x10] sm:$0xff] }
  0xbf   : > { %1614 = vmatprep.subr.bf16.mxu0 %v2349_v48  ;;  %1667 = vmatprep.subr.bf16.mxu1 %v2351_v49  ;;  %v2978_v48 = vcombine.low %v351_v31, %v355_v32  ;;  %v2314_v49 = vcombine.low %v409_v23, %v413_v26  ;;  %v364_v23 = vld [vmem:[%s2872_s7 + $0x30] sm:$0xff]  ;;  %v365_v26 = vld [vmem:[%s2872_s7 + $0x38] sm:$0xff] }
  0xc0   : > { %v2267_v31 = vcombine.high %v361_v25, %v365_v26  ;;  %v480_v32 = vld [vmem:[%s2872_s7 + $0x3d0] sm:$0xff]  ;;  %v2264_v42 = vcombine.low %v360_v22, %v364_v23  ;;  %v2266_v43 = vcombine.low %v361_v25, %v365_v26 }
  0xc6   : > { %1615 = vmatpush2.bf16.xpose.msra.mxu0 %v2348_v54  ;;  %1668 = vmatpush2.bf16.xpose.msra.mxu1 %v2350_v55  ;;  %v392_v54 = vld [vmem:[%s2872_s7 + $0x110] sm:$0xff] }
  0xc7   : > { %1616 = vmatprep.subr.bf16.mxu0 %v2341_v56  ;;  %1669 = vmatprep.subr.bf16.mxu1 %v2343_v57  ;;  %v396_v55 = vld [vmem:[%s2872_s7 + $0x130] sm:$0xff]  ;;  %v393_v56 = vld [vmem:[%s2872_s7 + $0x118] sm:$0xff] }
  0xc8   : > { %v397_v57 = vld [vmem:[%s2872_s7 + $0x138] sm:$0xff]  ;;  %v2297_v60 = vcombine.high %v392_v54, %v396_v55  ;;  %v2296_v2 = vcombine.low %v392_v54, %v396_v55 }
  0xc9   : > { %v2299_v61 = vcombine.high %v393_v56, %v397_v57  ;;  %v2298_v3 = vcombine.low %v393_v56, %v397_v57 }
  0xce   : > { %1617 = vmatpush2.bf16.xpose.msra.mxu0 %v2340_v62  ;;  %1670 = vmatpush2.bf16.xpose.msra.mxu1 %v2342_v63  ;;  %v384_v62 = vld [vmem:[%s2872_s7 + $0xd0] sm:$0xff] }
  0xcf   : > { %1618 = vmatprep.subr.bf16.mxu0 %v2333_v0  ;;  %1671 = vmatprep.subr.bf16.mxu1 %v2335_v1  ;;  %v388_v63 = vld [vmem:[%s2872_s7 + $0xf0] sm:$0xff]  ;;  %v385_v0 = vld [vmem:[%s2872_s7 + $0xd8] sm:$0xff] }
  0xd0   : > { %v389_v1 = vld [vmem:[%s2872_s7 + $0xf8] sm:$0xff]  ;;  %v2289_v4 = vcombine.high %v384_v62, %v388_v63  ;;  %v2288_v10 = vcombine.low %v384_v62, %v388_v63 }
  0xd1   : > { %v2291_v5 = vcombine.high %v385_v0, %v389_v1  ;;  %v2290_v11 = vcombine.low %v385_v0, %v389_v1 }
  0xd6   : > { %1619 = vmatpush2.bf16.xpose.msra.mxu0 %v2332_v6  ;;  %1672 = vmatpush2.bf16.xpose.msra.mxu1 %v2334_v7  ;;  %v376_v6 = vld [vmem:[%s2872_s7 + $0x90] sm:$0xff] }
  0xd7   : > { %1620 = vmatprep.subr.bf16.mxu0 %v2325_v8  ;;  %1673 = vmatprep.subr.bf16.mxu1 %v2327_v9  ;;  %v380_v7 = vld [vmem:[%s2872_s7 + $0xb0] sm:$0xff]  ;;  %v377_v8 = vld [vmem:[%s2872_s7 + $0x98] sm:$0xff] }
  0xd8   : > { %v381_v9 = vld [vmem:[%s2872_s7 + $0xb8] sm:$0xff]  ;;  %v2281_v12 = vcombine.high %v376_v6, %v380_v7  ;;  %v2280_v18 = vcombine.low %v376_v6, %v380_v7 }
  0xd9   : > { %v2283_v13 = vcombine.high %v377_v8, %v381_v9  ;;  %v2282_v19 = vcombine.low %v377_v8, %v381_v9 }
  0xde   : > { %1621 = vmatpush2.bf16.xpose.msra.mxu0 %v2324_v14  ;;  %1674 = vmatpush2.bf16.xpose.msra.mxu1 %v2326_v15  ;;  %v368_v14 = vld [vmem:[%s2872_s7 + $0x50] sm:$0xff] }
  0xdf   : > { %1696 = vmatprep.subr.bf16.mxu0 %v2321_v16  ;;  %1749 = vmatprep.subr.bf16.mxu1 %v2323_v17  ;;  %v372_v15 = vld [vmem:[%s2872_s7 + $0x70] sm:$0xff]  ;;  %v369_v16 = vld [vmem:[%s2872_s7 + $0x58] sm:$0xff] }
  0xe0   : > { %v373_v17 = vld [vmem:[%s2872_s7 + $0x78] sm:$0xff]  ;;  %v2273_v20 = vcombine.high %v368_v14, %v372_v15  ;;  %v2272_v27 = vcombine.low %v368_v14, %v372_v15 }
  0xe1   : > { %v2275_v21 = vcombine.high %v369_v16, %v373_v17  ;;  %v2274_v28 = vcombine.low %v369_v16, %v373_v17 }
  0xe5   : > { %1623 = vmatmul.mubr.bf16.vlgmr.msra.gmra.mxu0 %v2896_v34  ;;  %1676 = vmatmul.mubr.bf16.vlgmr.msra.gmra.mxu1 %v2902_v40 }
  0xe6   : > { %1697 = vmatpush1.bf16.xpose.msra.mxu0 %v2320_v30  ;;  %1750 = vmatpush1.bf16.xpose.msra.mxu1 %v2322_v33  ;;  %v2265_v30 = vcombine.high %v360_v22, %v364_v23  ;;  %v484_v33 = vld [vmem:[%s2872_s7 + $0x3f0] sm:$0xff] }
  0xe7   : > { %1698 = vmatprep.subr.bf16.mxu0 %v2313_v36  ;;  %1751 = vmatprep.subr.bf16.mxu1 %v2315_v37  ;;  %v481_v36 = vld [vmem:[%s2872_s7 + $0x3d8] sm:$0xff]  ;;  %v2385_v44 = vcombine.high %v480_v32, %v484_v33  ;;  %v2384_v54 = vcombine.low %v480_v32, %v484_v33 }
  0xe8   : > { %1632 = vmatprep.mubr.bf16.mxu0 %v2964_v38  ;;  %1685 = vmatprep.mubr.bf16.mxu1 %v2967_v39  ;;  %v485_v37 = vld [vmem:[%s2872_s7 + $0x3f8] sm:$0xff] }
  0xe9   : > { %v2387_v45 = vcombine.high %v481_v36, %v485_v37  ;;  %v2386_v55 = vcombine.low %v481_v36, %v485_v37 }
  0xed   : > { %1633 = vmatmul.mubr.bf16.gmra.mxu0 %v2976_v46  ;;  %1686 = vmatmul.mubr.bf16.gmra.mxu1 %v2978_v48 }
  0xee   : > { %1699 = vmatpush1.bf16.xpose.msra.mxu0 %v2312_v47  ;;  %1752 = vmatpush1.bf16.xpose.msra.mxu1 %v2314_v49  ;;  %v472_v47 = vld [vmem:[%s2872_s7 + $0x390] sm:$0xff] }
  0xef   : > { %1700 = vmatprep.subr.bf16.mxu0 %v2305_v50  ;;  %1753 = vmatprep.subr.bf16.mxu1 %v2307_v51  ;;  %v476_v49 = vld [vmem:[%s2872_s7 + $0x3b0] sm:$0xff]  ;;  %v473_v50 = vld [vmem:[%s2872_s7 + $0x398] sm:$0xff] }
  0xf0   : > { %1728 = vmatprep.mubr.bf16.mxu0 %v2980_v52  ;;  %1781 = vmatprep.mubr.bf16.mxu1 %v2983_v53  ;;  %v477_v51 = vld [vmem:[%s2872_s7 + $0x3b8] sm:$0xff]  ;;  %v2377_v56 = vcombine.high %v472_v47, %v476_v49  ;;  %v2376_v62 = vcombine.low %v472_v47, %v476_v49 }
  0xf1   : > { %v2379_v57 = vcombine.high %v473_v50, %v477_v51  ;;  %v2378_v63 = vcombine.low %v473_v50, %v477_v51 }
  0xf6   : > { %1701 = vmatpush1.bf16.xpose.msra.mxu0 %v2304_v58  ;;  %1754 = vmatpush1.bf16.xpose.msra.mxu1 %v2306_v59  ;;  %v464_v58 = vld [vmem:[%s2872_s7 + $0x350] sm:$0xff] }
  0xf7   : > { %1702 = vmatprep.subr.bf16.mxu0 %v2297_v60  ;;  %1755 = vmatprep.subr.bf16.mxu1 %v2299_v61  ;;  %v468_v59 = vld [vmem:[%s2872_s7 + $0x370] sm:$0xff]  ;;  %v465_v60 = vld [vmem:[%s2872_s7 + $0x358] sm:$0xff] }
  0xf8   : > { %v469_v61 = vld [vmem:[%s2872_s7 + $0x378] sm:$0xff]  ;;  %v2369_v0 = vcombine.high %v464_v58, %v468_v59  ;;  %v2368_v6 = vcombine.low %v464_v58, %v468_v59 }
  0xf9   : > { %v2371_v1 = vcombine.high %v465_v60, %v469_v61  ;;  %v2370_v7 = vcombine.low %v465_v60, %v469_v61 }
  0xfe   : > { %1703 = vmatpush1.bf16.xpose.msra.mxu0 %v2296_v2  ;;  %1756 = vmatpush1.bf16.xpose.msra.mxu1 %v2298_v3  ;;  %v456_v2 = vld [vmem:[%s2872_s7 + $0x310] sm:$0xff] }
  0xff   : > { %1704 = vmatprep.subr.bf16.mxu0 %v2289_v4  ;;  %1757 = vmatprep.subr.bf16.mxu1 %v2291_v5  ;;  %v460_v3 = vld [vmem:[%s2872_s7 + $0x330] sm:$0xff]  ;;  %v457_v4 = vld [vmem:[%s2872_s7 + $0x318] sm:$0xff] }
 0x100   : > { %v461_v5 = vld [vmem:[%s2872_s7 + $0x338] sm:$0xff]  ;;  %v2361_v8 = vcombine.high %v456_v2, %v460_v3  ;;  %v2360_v14 = vcombine.low %v456_v2, %v460_v3  ;;  %v535_v2 = vld [vmem:[%s2872_s7 + $0x588] sm:$0xff] }
 0x101   : > { %v2363_v9 = vcombine.high %v457_v4, %v461_v5  ;;  %v2362_v15 = vcombine.low %v457_v4, %v461_v5  ;;  %v539_v3 = vld [vmem:[%s2872_s7 + $0x5a8] sm:$0xff]  ;;  %v353_v5 = vld [vmem:[#allocation3 + $0x58] sm:$0xff] }
 0x106   : > { %1705 = vmatpush1.bf16.xpose.msra.mxu0 %v2288_v10  ;;  %1758 = vmatpush1.bf16.xpose.msra.mxu1 %v2290_v11  ;;  %v448_v10 = vld [vmem:[%s2872_s7 + $0x2d0] sm:$0xff] }
 0x107   : > { %1706 = vmatprep.subr.bf16.mxu0 %v2281_v12  ;;  %1759 = vmatprep.subr.bf16.mxu1 %v2283_v13  ;;  %v452_v11 = vld [vmem:[%s2872_s7 + $0x2f0] sm:$0xff]  ;;  %v449_v12 = vld [vmem:[%s2872_s7 + $0x2d8] sm:$0xff] }
 0x108   : > { %v453_v13 = vld [vmem:[%s2872_s7 + $0x2f8] sm:$0xff]  ;;  %v2353_v16 = vcombine.high %v448_v10, %v452_v11  ;;  %v2352_v22 = vcombine.low %v448_v10, %v452_v11  ;;  %v2439_v10 = vcombine.high %v535_v2, %v539_v3 }
 0x109   : > { %v2355_v17 = vcombine.high %v449_v12, %v453_v13  ;;  %v2354_v23 = vcombine.low %v449_v12, %v453_v13  ;;  %v526_v12 = vld [vmem:[%s2872_s7 + $0x540] sm:$0xff] }
 0x10a   : > { %v530_v13 = vld [vmem:[%s2872_s7 + $0x560] sm:$0xff] }
 0x10e   : > { %1707 = vmatpush1.bf16.xpose.msra.mxu0 %v2280_v18  ;;  %1760 = vmatpush1.bf16.xpose.msra.mxu1 %v2282_v19  ;;  %v440_v18 = vld [vmem:[%s2872_s7 + $0x290] sm:$0xff] }
 0x10f   : > { %1708 = vmatprep.subr.bf16.mxu0 %v2273_v20  ;;  %1761 = vmatprep.subr.bf16.mxu1 %v2275_v21  ;;  %v444_v19 = vld [vmem:[%s2872_s7 + $0x2b0] sm:$0xff]  ;;  %v441_v20 = vld [vmem:[%s2872_s7 + $0x298] sm:$0xff] }
 0x110   : > { %v445_v21 = vld [vmem:[%s2872_s7 + $0x2b8] sm:$0xff]  ;;  %v2345_v25 = vcombine.high %v440_v18, %v444_v19  ;;  %v2344_v32 = vcombine.low %v440_v18, %v444_v19  ;;  %v2438_v19 = vcombine.low %v535_v2, %v539_v3  ;;  %v487_v2 = vld [vmem:[%s2872_s7 + $0x408] sm:$0xff] }
 0x111   : > { %v2347_v26 = vcombine.high %v441_v20, %v445_v21  ;;  %v2346_v33 = vcombine.low %v441_v20, %v445_v21  ;;  %v2429_v20 = vcombine.high %v526_v12, %v530_v13  ;;  %v491_v3 = vld [vmem:[%s2872_s7 + $0x428] sm:$0xff] }
 0x116   : > { %1709 = vmatpush1.bf16.xpose.msra.mxu0 %v2272_v27  ;;  %1762 = vmatpush1.bf16.xpose.msra.mxu1 %v2274_v28  ;;  %v432_v27 = vld [vmem:[%s2872_s7 + $0x250] sm:$0xff] }
 0x117   : > { %1710 = vmatprep.subr.bf16.mxu0 %v2265_v30  ;;  %1763 = vmatprep.subr.bf16.mxu1 %v2267_v31  ;;  %v436_v28 = vld [vmem:[%s2872_s7 + $0x270] sm:$0xff]  ;;  %v433_v30 = vld [vmem:[%s2872_s7 + $0x258] sm:$0xff] }
 0x118   : > { %v437_v31 = vld [vmem:[%s2872_s7 + $0x278] sm:$0xff]  ;;  %v2337_v36 = vcombine.high %v432_v27, %v436_v28  ;;  %v2336_v47 = vcombine.low %v432_v27, %v436_v28  ;;  %v2428_v27 = vcombine.low %v526_v12, %v530_v13 }
 0x119   : > { %v2339_v37 = vcombine.high %v433_v30, %v437_v31  ;;  %v2338_v49 = vcombine.low %v433_v30, %v437_v31  ;;  %v545_v12 = vld [vmem:[%s2872_s7 + $0x5d8] sm:$0xff] }
 0x11a   : > { %v549_v13 = vld [vmem:[%s2872_s7 + $0x5f8] sm:$0xff] }
 0x11e   : > { %1711 = vmatpush1.bf16.xpose.msra.mxu0 %v2264_v42  ;;  %1764 = vmatpush1.bf16.xpose.msra.mxu1 %v2266_v43  ;;  %v424_v42 = vld [vmem:[%s2872_s7 + $0x210] sm:$0xff] }
 0x11f   : > { %1712 = vmatprep.subr.bf16.mxu0 %v2385_v44  ;;  %1765 = vmatprep.subr.bf16.mxu1 %v2387_v45  ;;  %v428_v43 = vld [vmem:[%s2872_s7 + $0x230] sm:$0xff]  ;;  %v425_v44 = vld [vmem:[%s2872_s7 + $0x218] sm:$0xff] }
 0x120   : > { %v429_v45 = vld [vmem:[%s2872_s7 + $0x238] sm:$0xff]  ;;  %v2329_v50 = vcombine.high %v424_v42, %v428_v43  ;;  %v2328_v58 = vcombine.low %v424_v42, %v428_v43 }
 0x121   : > { %v2331_v51 = vcombine.high %v425_v44, %v429_v45  ;;  %v2330_v59 = vcombine.low %v425_v44, %v429_v45  ;;  %v502_v44 = vld [vmem:[%s2872_s7 + $0x480] sm:$0xff] }
 0x122   : > { %v506_v45 = vld [vmem:[%s2872_s7 + $0x4a0] sm:$0xff] }
 0x126   : > { %1713 = vmatpush2.bf16.xpose.msra.mxu0 %v2384_v54  ;;  %1766 = vmatpush2.bf16.xpose.msra.mxu1 %v2386_v55  ;;  %v542_v54 = vld [vmem:[%s2872_s7 + $0x5c0] sm:$0xff] }
 0x127   : > { %1714 = vmatprep.subr.bf16.mxu0 %v2377_v56  ;;  %1767 = vmatprep.subr.bf16.mxu1 %v2379_v57  ;;  %v546_v55 = vld [vmem:[%s2872_s7 + $0x5e0] sm:$0xff]  ;;  %v543_v56 = vld [vmem:[%s2872_s7 + $0x5c8] sm:$0xff] }
 0x128   : > { %v547_v57 = vld [vmem:[%s2872_s7 + $0x5e8] sm:$0xff]  ;;  %v2445_v60 = vcombine.high %v542_v54, %v546_v55  ;;  %v2444_v4 = vcombine.low %v542_v54, %v546_v55  ;;  %v2405_v54 = vcombine.high %v502_v44, %v506_v45 }
 0x129   : > { %v2447_v61 = vcombine.high %v543_v56, %v547_v57 }
 0x12e   : > { %1715 = vmatpush2.bf16.xpose.msra.mxu0 %v2376_v62  ;;  %1768 = vmatpush2.bf16.xpose.msra.mxu1 %v2378_v63  ;;  %v352_v62 = vld [vmem:[#allocation3 + $0x50] sm:$0xff] }
 0x12f   : > { %1716 = vmatprep.subr.bf16.mxu0 %v2369_v0  ;;  %1769 = vmatprep.subr.bf16.mxu1 %v2371_v1  ;;  %v356_v63 = vld [vmem:[#allocation3 + $0x70] sm:$0xff]  ;;  %v534_v0 = vld [vmem:[%s2872_s7 + $0x580] sm:$0xff] }
 0x130   : > { %v538_v1 = vld [vmem:[%s2872_s7 + $0x5a0] sm:$0xff] }
 0x136   : > { %1717 = vmatpush2.bf16.xpose.msra.mxu0 %v2368_v6  ;;  %1770 = vmatpush2.bf16.xpose.msra.mxu1 %v2370_v7  ;;  %v357_v6 = vld [vmem:[#allocation3 + $0x78] sm:$0xff]  ;;  %v2446_v7 = vcombine.low %v543_v56, %v547_v57  ;;  %v494_v56 = vld [vmem:[%s2872_s7 + $0x440] sm:$0xff] }
 0x137   : > { %1718 = vmatprep.subr.bf16.mxu0 %v2361_v8  ;;  %1771 = vmatprep.subr.bf16.mxu1 %v2363_v9  ;;  %v3048_v8 = vcombine.high %v352_v62, %v356_v63  ;;  %v2437_v9 = vcombine.high %v534_v0, %v538_v1  ;;  %v3051_v11 = vcombine.high %v353_v5, %v357_v6  ;;  %v498_v57 = vld [vmem:[%s2872_s7 + $0x460] sm:$0xff] }
 0x138   : > { %v3062_v18 = vcombine.low %v353_v5, %v357_v6 }
 0x13e   : > { %1719 = vmatpush2.bf16.xpose.msra.mxu0 %v2360_v14  ;;  %1772 = vmatpush2.bf16.xpose.msra.mxu1 %v2362_v15  ;;  %v3057_v14 = vcombine.low %v352_v62, %v356_v63  ;;  %v527_v15 = vld [vmem:[%s2872_s7 + $0x548] sm:$0xff]  ;;  %v2397_v62 = vcombine.high %v494_v56, %v498_v57 }
 0x13f   : > { %1720 = vmatprep.subr.bf16.mxu0 %v2353_v16  ;;  %1773 = vmatprep.subr.bf16.mxu1 %v2355_v17  ;;  %v531_v16 = vld [vmem:[%s2872_s7 + $0x568] sm:$0xff]  ;;  %v2436_v17 = vcombine.low %v534_v0, %v538_v1  ;;  %v486_v0 = vld [vmem:[%s2872_s7 + $0x400] sm:$0xff] }
 0x140   : > { %v2431_v21 = vcombine.high %v527_v15, %v531_v16  ;;  %v2430_v28 = vcombine.low %v527_v15, %v531_v16  ;;  %v490_v1 = vld [vmem:[%s2872_s7 + $0x420] sm:$0xff]  ;;  %v2390_v16 = vcombine.low %v487_v2, %v491_v3 }
 0x141   : > { %v2389_v6 = vcombine.high %v486_v0, %v490_v1  ;;  %v2388_v15 = vcombine.low %v486_v0, %v490_v1  ;;  %v497_v0 = vld [vmem:[%s2872_s7 + $0x458] sm:$0xff] }
 0x142   : > { %v501_v1 = vld [vmem:[%s2872_s7 + $0x478] sm:$0xff] }
 0x146   : > { %1721 = vmatpush2.bf16.xpose.msra.mxu0 %v2352_v22  ;;  %1774 = vmatpush2.bf16.xpose.msra.mxu1 %v2354_v23  ;;  %v518_v22 = vld [vmem:[%s2872_s7 + $0x500] sm:$0xff] }
 0x147   : > { %1722 = vmatprep.subr.bf16.mxu0 %v2345_v25  ;;  %1775 = vmatprep.subr.bf16.mxu1 %v2347_v26  ;;  %v522_v23 = vld [vmem:[%s2872_s7 + $0x520] sm:$0xff]  ;;  %v519_v25 = vld [vmem:[%s2872_s7 + $0x508] sm:$0xff] }
 0x148   : > { %v523_v26 = vld [vmem:[%s2872_s7 + $0x528] sm:$0xff]  ;;  %v2421_v30 = vcombine.high %v518_v22, %v522_v23 }
 0x149   : > { %v2423_v31 = vcombine.high %v519_v25, %v523_v26  ;;  %v2422_v42 = vcombine.low %v519_v25, %v523_v26  ;;  %v2450_v26 = vcombine.low %v545_v12, %v549_v13 }
 0x14e   : > { %1723 = vmatpush2.bf16.xpose.msra.mxu0 %v2344_v32  ;;  %1776 = vmatpush2.bf16.xpose.msra.mxu1 %v2346_v33  ;;  %v510_v32 = vld [vmem:[%s2872_s7 + $0x4c0] sm:$0xff] }
 0x14f   : > { %1724 = vmatprep.subr.bf16.mxu0 %v2337_v36  ;;  %1777 = vmatprep.subr.bf16.mxu1 %v2339_v37  ;;  %v514_v33 = vld [vmem:[%s2872_s7 + $0x4e0] sm:$0xff]  ;;  %v511_v36 = vld [vmem:[%s2872_s7 + $0x4c8] sm:$0xff]  ;;  %v2420_v37 = vcombine.low %v518_v22, %v522_v23  ;;  %v537_v22 = vld [vmem:[%s2872_s7 + $0x598] sm:$0xff] }
 0x150   : > { %v2413_v43 = vcombine.high %v510_v32, %v514_v33  ;;  %v541_v23 = vld [vmem:[%s2872_s7 + $0x5b8] sm:$0xff] }
 0x156   : > { %1725 = vmatpush2.bf16.xpose.msra.mxu0 %v2336_v47  ;;  %1778 = vmatpush2.bf16.xpose.msra.mxu1 %v2338_v49  ;;  %v503_v47 = vld [vmem:[%s2872_s7 + $0x488] sm:$0xff] }
 0x157   : > { %1726 = vmatprep.subr.bf16.mxu0 %v2329_v50  ;;  %1779 = vmatprep.subr.bf16.mxu1 %v2331_v51  ;;  %v507_v49 = vld [vmem:[%s2872_s7 + $0x4a8] sm:$0xff]  ;;  %v2412_v50 = vcombine.low %v510_v32, %v514_v33  ;;  %v529_v32 = vld [vmem:[%s2872_s7 + $0x558] sm:$0xff] }
 0x158   : > { %v2407_v55 = vcombine.high %v503_v47, %v507_v49  ;;  %v533_v33 = vld [vmem:[%s2872_s7 + $0x578] sm:$0xff] }
 0x15e   : > { %1727 = vmatpush2.bf16.xpose.msra.mxu0 %v2328_v58  ;;  %1780 = vmatpush2.bf16.xpose.msra.mxu1 %v2330_v59  ;;  %v495_v58 = vld [vmem:[%s2872_s7 + $0x448] sm:$0xff] }
 0x15f   : > { %1802 = vmatprep.subr.bf16.mxu0 %v2445_v60  ;;  %1851 = vmatprep.subr.bf16.mxu1 %v2447_v61  ;;  %v499_v59 = vld [vmem:[%s2872_s7 + $0x468] sm:$0xff]  ;;  %v2404_v60 = vcombine.low %v502_v44, %v506_v45  ;;  %v2406_v61 = vcombine.low %v503_v47, %v507_v49  ;;  %v516_v45 = vld [vmem:[%s2872_s7 + $0x4f0] sm:$0xff]  ;;  %v513_v47 = vld [vmem:[%s2872_s7 + $0x4d8] sm:$0xff] }
 0x160   : > { %v2399_v63 = vcombine.high %v495_v58, %v499_v59  ;;  %v2398_v5 = vcombine.low %v495_v58, %v499_v59 }
 0x165   : > { %1729 = vmatmul.mubr.bf16.vlgmr.msra.gmra.mxu0 %v2959_v24  ;;  %1782 = vmatmul.mubr.bf16.vlgmr.msra.gmra.mxu1 %v2962_v29 }
 0x166   : > { %1803 = vmatpush1.bf16.xpose.msra.mxu0 %v2444_v4  ;;  %1852 = vmatpush1.bf16.xpose.msra.mxu1 %v2446_v7  ;;  %v2396_v4 = vcombine.low %v494_v56, %v498_v57  ;;  %v2391_v7 = vcombine.high %v487_v2, %v491_v3  ;;  %v505_v56 = vld [vmem:[%s2872_s7 + $0x498] sm:$0xff] }
 0x167   : > { %1738 = vmatprep.mubr.bf16.mxu0 %v3048_v8  ;;  %1804 = vmatprep.subr.bf16.mxu0 %v2437_v9  ;;  %v544_v9 = vld [vmem:[%s2872_s7 + $0x5d0] sm:$0xff]  ;;  %v509_v57 = vld [vmem:[%s2872_s7 + $0x4b8] sm:$0xff] }
 0x168   : > { %1853 = vmatprep.subr.bf16.mxu1 %v2439_v10  ;;  %1791 = vmatprep.mubr.bf16.mxu1 %v3051_v11  ;;  %v548_v10 = vld [vmem:[%s2872_s7 + $0x5f0] sm:$0xff]  ;;  %v2410_v3 = vcombine.low %v505_v56, %v509_v57 }
 0x169   : > { %v2448_v25 = vcombine.low %v544_v9, %v548_v10 }
 0x16d   : > { %1739 = vmatmul.mubr.bf16.gmra.mxu0 %v3057_v14  ;;  %1792 = vmatmul.mubr.bf16.gmra.mxu1 %v3062_v18 }
 0x16e   : > { %1805 = vmatpush1.bf16.xpose.msra.mxu0 %v2436_v17  ;;  %1854 = vmatpush1.bf16.xpose.msra.mxu1 %v2438_v19  ;;  %v2449_v17 = vcombine.high %v544_v9, %v548_v10  ;;  %v2451_v19 = vcombine.high %v545_v12, %v549_v13  ;;  %v489_v9 = vld [vmem:[%s2872_s7 + $0x418] sm:$0xff]  ;;  %v2402_v13 = vcombine.low %v497_v0, %v501_v1 }
 0x16f   : > { %1806 = vmatprep.subr.bf16.mxu0 %v2429_v20  ;;  %1855 = vmatprep.subr.bf16.mxu1 %v2431_v21  ;;  %v536_v20 = vld [vmem:[%s2872_s7 + $0x590] sm:$0xff]  ;;  %v493_v10 = vld [vmem:[%s2872_s7 + $0x438] sm:$0xff] }
 0x170   : > { %1834 = vmatprep.mubr.bf16.mxu0 %v2898_v35  ;;  %1883 = vmatprep.mubr.bf16.mxu1 %v2904_v41  ;;  %v515_v35 = vld [vmem:[%s2872_s7 + $0x4e8] sm:$0xff]  ;;  %v540_v21 = vld [vmem:[%s2872_s7 + $0x5b0] sm:$0xff] }
 0x171   : > { %v2415_v41 = vcombine.high %v511_v36, %v515_v35  ;;  %v2414_v51 = vcombine.low %v511_v36, %v515_v35  ;;  %v2440_v36 = vcombine.low %v536_v20, %v540_v21 }
 0x176   : > { %1807 = vmatpush1.bf16.xpose.msra.mxu0 %v2428_v27  ;;  %1856 = vmatpush1.bf16.xpose.msra.mxu1 %v2430_v28  ;;  %v2441_v27 = vcombine.high %v536_v20, %v540_v21  ;;  %v2443_v28 = vcombine.high %v537_v22, %v541_v23 }
 0x177   : > { %1808 = vmatprep.subr.bf16.mxu0 %v2421_v30  ;;  %1857 = vmatprep.subr.bf16.mxu1 %v2423_v31  ;;  %v528_v30 = vld [vmem:[%s2872_s7 + $0x550] sm:$0xff] }
 0x178   : > { %v532_v31 = vld [vmem:[%s2872_s7 + $0x570] sm:$0xff] }
 0x179   : > { %v2433_v35 = vcombine.high %v528_v30, %v532_v31 }
 0x17e   : > { %1809 = vmatpush1.bf16.xpose.msra.mxu0 %v2420_v37  ;;  %1858 = vmatpush1.bf16.xpose.msra.mxu1 %v2422_v42  ;;  %v524_v37 = vld [vmem:[%s2872_s7 + $0x530] sm:$0xff]  ;;  %v525_v42 = vld [vmem:[%s2872_s7 + $0x538] sm:$0xff] }
 0x17f   : > { %1810 = vmatprep.subr.bf16.mxu0 %v2413_v43  ;;  %1859 = vmatprep.subr.bf16.mxu1 %v2415_v41  ;;  %v2432_v43 = vcombine.low %v528_v30, %v532_v31  ;;  %v303_v31 = vlaneseq }
 0x186   : > { %1811 = vmatpush1.bf16.xpose.msra.mxu0 %v2412_v50  ;;  %1860 = vmatpush1.bf16.xpose.msra.mxu1 %v2414_v51 }
 0x187   : > { %1812 = vmatprep.subr.bf16.mxu0 %v2405_v54  ;;  %1861 = vmatprep.subr.bf16.mxu1 %v2407_v55  ;;  %v504_v54 = vld [vmem:[%s2872_s7 + $0x490] sm:$0xff] }
 0x188   : > { %v508_v55 = vld [vmem:[%s2872_s7 + $0x4b0] sm:$0xff] }
 0x189   : > { %v2408_v2 = vcombine.low %v504_v54, %v508_v55 }
 0x18e   : > { %1813 = vmatpush1.bf16.xpose.msra.mxu0 %v2404_v60  ;;  %1862 = vmatpush1.bf16.xpose.msra.mxu1 %v2406_v61  ;;  %v2409_v60 = vcombine.high %v504_v54, %v508_v55  ;;  %v2411_v61 = vcombine.high %v505_v56, %v509_v57 }
 0x18f   : > { %1814 = vmatprep.subr.bf16.mxu0 %v2397_v62  ;;  %1863 = vmatprep.subr.bf16.mxu1 %v2399_v63  ;;  %v496_v62 = vld [vmem:[%s2872_s7 + $0x450] sm:$0xff] }
 0x190   : > { %v500_v63 = vld [vmem:[%s2872_s7 + $0x470] sm:$0xff] }
 0x191   : > { %v2400_v12 = vcombine.low %v496_v62, %v500_v63 }
 0x196   : > { %1815 = vmatpush1.bf16.xpose.msra.mxu0 %v2396_v4  ;;  %1864 = vmatpush1.bf16.xpose.msra.mxu1 %v2398_v5  ;;  %v2401_v4 = vcombine.high %v496_v62, %v500_v63  ;;  %v2403_v5 = vcombine.high %v497_v0, %v501_v1 }
 0x197   : > { %1816 = vmatprep.subr.bf16.mxu0 %v2389_v6  ;;  %1865 = vmatprep.subr.bf16.mxu1 %v2391_v7  ;;  %v488_v6 = vld [vmem:[%s2872_s7 + $0x410] sm:$0xff] }
 0x198   : > { %v492_v7 = vld [vmem:[%s2872_s7 + $0x430] sm:$0xff] }
 0x19e   : > { %1817 = vmatpush1.bf16.xpose.msra.mxu0 %v2388_v15  ;;  %1866 = vmatpush1.bf16.xpose.msra.mxu1 %v2390_v16  ;;  %v2393_v15 = vcombine.high %v488_v6, %v492_v7  ;;  %v2395_v16 = vcombine.high %v489_v9, %v493_v10 }
 0x19f   : > { %1900 = vmatprep.subr.bf16.mxu0 %v2449_v17  ;;  %1949 = vmatprep.subr.bf16.mxu1 %v2451_v19  ;;  %v2392_v17 = vcombine.low %v488_v6, %v492_v7  ;;  %v2394_v19 = vcombine.low %v489_v9, %v493_v10 }
 0x1a5   : > { %1835 = vmatmul.mubr.bf16.vlgmr.msra.gmra.mxu0 %v2896_v34  ;;  %1884 = vmatmul.mubr.bf16.vlgmr.msra.gmra.mxu1 %v2902_v40  ;;  %v2442_v34 = vcombine.low %v537_v22, %v541_v23  ;;  %v2435_v40 = vcombine.high %v529_v32, %v533_v33  ;;  %v1624_v20 = vpop.f32.mrf.mxu0  ;;  %v1677_v21 = vpop.f32.mrf.mxu1 }
 0x1a6   : > { %1901 = vmatpush1.bf16.xpose.msra.mxu0 %v2448_v25  ;;  %1950 = vmatpush1.bf16.xpose.msra.mxu1 %v2450_v26 }
 0x1a7   : > { %1902 = vmatprep.subr.bf16.mxu0 %v2441_v27  ;;  %1951 = vmatprep.subr.bf16.mxu1 %v2443_v28  ;;  %v1626_v22 = vpop.f32.mrf.mxu0  ;;  %v1679_v23 = vpop.f32.mrf.mxu1 }
 0x1a8   : > { %1842 = vmatprep.mubr.bf16.mxu0 %v2964_v38  ;;  %1891 = vmatprep.mubr.bf16.mxu1 %v2967_v39  ;;  %v520_v38 = vld [vmem:[%s2872_s7 + $0x510] sm:$0xff]  ;;  %v521_v39 = vld [vmem:[%s2872_s7 + $0x518] sm:$0xff] }
 0x1a9   : > { %v2425_v41 = vcombine.high %v520_v38, %v524_v37  ;;  %v2427_v44 = vcombine.high %v521_v39, %v525_v42  ;;  %v2424_v49 = vcombine.low %v520_v38, %v524_v37  ;;  %v2426_v50 = vcombine.low %v521_v39, %v525_v42  ;;  %v1628_v25 = vpop.f32.mrf.mxu0  ;;  %v1681_v26 = vpop.f32.mrf.mxu1 }
 0x1aa   : > { %v1680_v37 = vadd.f32 %v1679_v23, %v1626_v22 }
 0x1ab   : > { %v1630_v27 = vpop.f32.mrf.mxu0  ;;  %v1683_v28 = vpop.f32.mrf.mxu1 }
 0x1ad   : > { %1843 = vmatmul.mubr.bf16.gmra.mxu0 %v2976_v46  ;;  %1892 = vmatmul.mubr.bf16.gmra.mxu1 %v2978_v48  ;;  %v2434_v46 = vcombine.low %v529_v32, %v533_v33  ;;  %v512_v48 = vld [vmem:[%s2872_s7 + $0x4d0] sm:$0xff]  ;;  %v1687_v30 = vpop.f32.mrf.mxu1  ;;  %v3135_v32 = vshrl.u32 %v303_v31, 7 }
 0x1ae   : > { %1903 = vmatpush1.bf16.xpose.msra.mxu0 %v2440_v36  ;;  %1952 = vmatpush1.bf16.xpose.msra.mxu1 %v2442_v34  ;;  %v2417_v51 = vcombine.high %v512_v48, %v516_v45  ;;  %v2416_v58 = vcombine.low %v512_v48, %v516_v45  ;;  %v1678_v36 = vadd.f32 %v1677_v21, %v1624_v20 }
 0x1af   : > { %1904 = vmatprep.subr.bf16.mxu0 %v2433_v35  ;;  %1953 = vmatprep.subr.bf16.mxu1 %v2435_v40  ;;  %v3138_v35 = vld [vmem:[%s255_s18] sm:$0x7]  ;;  %v309_v40 = vsub.s32 1, %v3135_v32 }
 0x1b0   : > { %1932 = vmatprep.mubr.bf16.mxu0 %v2980_v52  ;;  %1981 = vmatprep.mubr.bf16.mxu1 %v2983_v53  ;;  %v517_v52 = vld [vmem:[%s2872_s7 + $0x4f8] sm:$0xff] }
 0x1b1   : > { %v2419_v53 = vcombine.high %v513_v47, %v517_v52  ;;  %v2418_v59 = vcombine.low %v513_v47, %v517_v52  ;;  %v310_v45 = vrot.slane %v3138_v35, %v309_v40 }
 0x1b6   : > { %1905 = vmatpush1.bf16.xpose.msra.mxu0 %v2432_v43  ;;  %1954 = vmatpush1.bf16.xpose.msra.mxu1 %v2434_v46 }
 0x1b7   : > { %1906 = vmatprep.subr.bf16.mxu0 %v2425_v41  ;;  %1955 = vmatprep.subr.bf16.mxu1 %v2427_v44  ;;  %v1682_v41 = vadd.f32 %v1681_v26, %v1628_v25 }
 0x1be   : > { %1907 = vmatpush1.bf16.xpose.msra.mxu0 %v2424_v49  ;;  %1956 = vmatpush1.bf16.xpose.msra.mxu1 %v2426_v50  ;;  %v1684_v49 = vadd.f32 %v1683_v28, %v1630_v27 }
 0x1bf   : > { %1908 = vmatprep.subr.bf16.mxu0 %v2417_v51  ;;  %1957 = vmatprep.subr.bf16.mxu1 %v2419_v53 }
 0x1c6   : > { %1909 = vmatpush1.bf16.xpose.msra.mxu0 %v2416_v58  ;;  %1958 = vmatpush1.bf16.xpose.msra.mxu1 %v2418_v59 }
 0x1c7   : > { %1910 = vmatprep.subr.bf16.mxu0 %v2409_v60  ;;  %1959 = vmatprep.subr.bf16.mxu1 %v2411_v61 }
 0x1ce   : > { %1911 = vmatpush1.bf16.xpose.msra.mxu0 %v2408_v2  ;;  %1960 = vmatpush1.bf16.xpose.msra.mxu1 %v2410_v3 }
 0x1cf   : > { %1912 = vmatprep.subr.bf16.mxu0 %v2401_v4  ;;  %1961 = vmatprep.subr.bf16.mxu1 %v2403_v5 }
 0x1d6   : > { %1913 = vmatpush1.bf16.xpose.msra.mxu0 %v2400_v12  ;;  %1962 = vmatpush1.bf16.xpose.msra.mxu1 %v2402_v13 }
 0x1d7   : > { %1914 = vmatprep.subr.bf16.mxu0 %v2393_v15  ;;  %1963 = vmatprep.subr.bf16.mxu1 %v2395_v16 }
 0x1de   : > { %1915 = vmatpush1.bf16.xpose.msra.mxu0 %v2392_v17  ;;  %1964 = vmatpush1.bf16.xpose.msra.mxu1 %v2394_v19 }
 0x1e5   : > { %1933 = vmatmul.mubr.bf16.vlgmr.msra.gmra.mxu0 %v2959_v24  ;;  %1982 = vmatmul.mubr.bf16.vlgmr.msra.gmra.mxu1 %v2962_v29  ;;  %v1634_v24 = vpop.f32.mrf.mxu0 }
 0x1e6   : > { %1940 = vmatprep.mubr.bf16.mxu0 %v3048_v8  ;;  %1989 = vmatprep.mubr.bf16.mxu1 %v3051_v11  ;;  %v1689_v8 = vpop.f32.mrf.mxu1  ;;  %v1688_v54 = vadd.f32 %v1687_v30, %v1634_v24 }
 0x1e7   : > { %v1636_v29 = vpop.f32.mrf.mxu0 }
 0x1e8   : > { %v1690_v62 = vadd.f32 %v1689_v8, %v1636_v29 }
 0x1e9   : > { %v1638_v11 = vpop.f32.mrf.mxu0 }
 0x1eb   : > { %v1640_v33 = vpop.f32.mrf.mxu0 }
 0x1ed   : > { %1941 = vmatmul.mubr.bf16.gmra.mxu0 %v3057_v14  ;;  %1990 = vmatmul.mubr.bf16.gmra.mxu1 %v3062_v18  ;;  %v1691_v14 = vpop.f32.mrf.mxu1  ;;  %v305_v18 = vsub.s32 0, %v3135_v32 }
 0x1ee   : > { %v1692_v3 = vadd.f32 %v1691_v14, %v1638_v11 }
 0x1ef   : > { %v1693_v34 = vpop.f32.mrf.mxu1  ;;  %v306_v43 = vrot.slane %v3138_v35, %v305_v18 }
 0x1f0   : > { %v1694_v13 = vadd.f32 %v1693_v34, %v1640_v33 }
 0x225   : > { %v1730_v38 = vpop.f32.mrf.mxu0  ;;  %v1783_v42 = vpop.f32.mrf.mxu1 }
 0x226   : > { %v1731_v39 = vadd.f32 %v1730_v38, %v1678_v36 }
 0x227   : > { %v1732_v46 = vpop.f32.mrf.mxu0  ;;  %v1785_v47 = vpop.f32.mrf.mxu1 }
 0x228   : > { %v1784_v44 = vadd.f32 %v1783_v42, %v1731_v39  ;;  %v1733_v48 = vadd.f32 %v1732_v46, %v1680_v37 }
 0x229   : > { %v1734_v52 = vpop.f32.mrf.mxu0  ;;  %v1787_v53 = vpop.f32.mrf.mxu1 }
 0x22a   : > { %v1786_v50 = vadd.f32 %v1785_v47, %v1733_v48  ;;  %v1735_v51 = vadd.f32 %v1734_v52, %v1682_v41  ;;  %v1998_v56 = vadd.f32 %v1784_v44, %v306_v43 }
 0x22b   : > { %v1736_v55 = vpop.f32.mrf.mxu0  ;;  %v1789_v60 = vpop.f32.mrf.mxu1 }
 0x22c   : > { %v1999_v57 = vadd.f32 %v1786_v50, %v310_v45  ;;  %v1788_v58 = vadd.f32 %v1787_v53, %v1735_v51  ;;  %v1737_v59 = vadd.f32 %v1736_v55, %v1684_v49 }
 0x22d   : > { %v1740_v61 = vpop.f32.mrf.mxu0  ;;  %v1793_v2 = vpop.f32.mrf.mxu1 }
 0x22e   : > { %v2466_v63 = vpack.c.bf16 %v1999_v57, %v1998_v56  ;;  %v1790_v0 = vadd.f32 %v1789_v60, %v1737_v59  ;;  %v1741_v1 = vadd.f32 %v1740_v61, %v1688_v54  ;;  %v2001_v5 = vadd.f32 %v1788_v58, %v306_v43 }
 0x22f   : > { %v1742_v4 = vpop.f32.mrf.mxu0  ;;  %v1795_v10 = vpop.f32.mrf.mxu1 }
 0x230   : > { %2077 = vst [vmem:[%s3144_s28] sm:$0xff] %v2466_v63  ;;  %v2002_v6 = vadd.f32 %v1790_v0, %v310_v45  ;;  %v1743_v7 = vadd.f32 %v1742_v4, %v1690_v62  ;;  %v1794_v9 = vadd.f32 %v1793_v2, %v1741_v1 }
 0x231   : > { %v1744_v12 = vpop.f32.mrf.mxu0  ;;  %v1797_v19 = vpop.f32.mrf.mxu1 }
 0x232   : > { %v2468_v15 = vpack.c.bf16 %v2002_v6, %v2001_v5  ;;  %v1745_v16 = vadd.f32 %v1744_v12, %v1692_v3  ;;  %v1796_v17 = vadd.f32 %v1795_v10, %v1743_v7  ;;  %v2004_v21 = vadd.f32 %v1794_v9, %v306_v43 }
 0x233   : > { %v1746_v20 = vpop.f32.mrf.mxu0  ;;  %v1799_v26 = vpop.f32.mrf.mxu1 }
 0x234   : > { %2079 = vst [vmem:[%s3144_s28 + $0xc] sm:$0xff] %v2468_v15  ;;  %v2005_v22 = vadd.f32 %v1796_v17, %v310_v45  ;;  %v1747_v23 = vadd.f32 %v1746_v20, %v1694_v13  ;;  %v1798_v25 = vadd.f32 %v1797_v19, %v1745_v16 }
 0x236   : > { %v2470_v27 = vpack.c.bf16 %v2005_v22, %v2004_v21  ;;  %v1800_v28 = vadd.f32 %v1799_v26, %v1747_v23  ;;  %v2007_v24 = vadd.f32 %v1798_v25, %v306_v43  ;;  %v313_v43 = vsub.s32 2, %v3135_v32 }
 0x238   : > { %2081 = vst [vmem:[%s3144_s28 + $0x18] sm:$0xff] %v2470_v27  ;;  %v2008_v30 = vadd.f32 %v1800_v28, %v310_v45  ;;  %v314_v52 = vrot.slane %v3138_v35, %v313_v43 }
 0x23a   : > { %v2472_v29 = vpack.c.bf16 %v2008_v30, %v2007_v24 }
 0x23c   : > { %2083 = vst [vmem:[%s3144_s28 + $0x24] sm:$0xff] %v2472_v29 }
 0x265   : > { %v1836_v31 = vpop.f32.mrf.mxu0  ;;  %v1885_v8 = vpop.f32.mrf.mxu1 }
 0x266   : > { %v1886_v48 = vadd.f32 %v1885_v8, %v1836_v31 }
 0x267   : > { %v1838_v11 = vpop.f32.mrf.mxu0  ;;  %v1887_v14 = vpop.f32.mrf.mxu1 }
 0x269   : > { %v1839_v33 = vpop.f32.mrf.mxu0  ;;  %v1888_v18 = vpop.f32.mrf.mxu1 }
 0x26a   : > { %v1889_v51 = vadd.f32 %v1888_v18, %v1839_v33 }
 0x26b   : > { %v1841_v36 = vpop.f32.mrf.mxu0  ;;  %v1890_v34 = vpop.f32.mrf.mxu1 }
 0x26d   : > { %v1844_v40 = vpop.f32.mrf.mxu0  ;;  %v1893_v38 = vpop.f32.mrf.mxu1 }
 0x26e   : > { %v1894_v60 = vadd.f32 %v1893_v38, %v1844_v40 }
 0x26f   : > { %v1846_v37 = vpop.f32.mrf.mxu0  ;;  %v1895_v39 = vpop.f32.mrf.mxu1 }
 0x271   : > { %v1847_v42 = vpop.f32.mrf.mxu0  ;;  %v1896_v46 = vpop.f32.mrf.mxu1 }
 0x272   : > { %v1897_v3 = vadd.f32 %v1896_v46, %v1847_v42 }
 0x273   : > { %v1849_v41 = vpop.f32.mrf.mxu0  ;;  %v1898_v44 = vpop.f32.mrf.mxu1 }
 0x2a5   : > { %v1934_v45 = vpop.f32.mrf.mxu0  ;;  %v1983_v49 = vpop.f32.mrf.mxu1 }
 0x2a6   : > { %v1935_v47 = vadd.f32 %v1934_v45, %v1886_v48 }
 0x2a7   : > { %v1936_v50 = vpop.f32.mrf.mxu0  ;;  %v1985_v54 = vpop.f32.mrf.mxu1 }
 0x2a8   : > { %v1984_v53 = vadd.f32 %v1983_v49, %v1935_v47 }
 0x2a9   : > { %v1937_v55 = vpop.f32.mrf.mxu0  ;;  %v1986_v58 = vpop.f32.mrf.mxu1 }
 0x2aa   : > { %v2000_v56 = vadd.f32 %v1984_v53, %v314_v52  ;;  %v1938_v57 = vadd.f32 %v1937_v55, %v1889_v51 }
 0x2ab   : > { %v1939_v59 = vpop.f32.mrf.mxu0  ;;  %v1988_v62 = vpop.f32.mrf.mxu1 }
 0x2ac   : > { %v2467_v61 = vpack.c.bf16 %v2000_v56, %v2000_v56  ;;  %v1987_v32 = vadd.f32 %v1986_v58, %v1938_v57 }
 0x2ad   : > { %v1942_v63 = vpop.f32.mrf.mxu0  ;;  %v1991_v1 = vpop.f32.mrf.mxu1 }
 0x2ae   : > { %2078 = vst [vmem:[%s3144_s28 + $0x8] sm:$0xf] %v2467_v61  ;;  %v2003_v0 = vadd.f32 %v1987_v32, %v314_v52  ;;  %v1943_v35 = vadd.f32 %v1942_v63, %v1894_v60 }
 0x2af   : > { %v1944_v2 = vpop.f32.mrf.mxu0  ;;  %v1993_v6 = vpop.f32.mrf.mxu1 }
 0x2b0   : > { %v2469_v4 = vpack.c.bf16 %v2003_v0, %v2003_v0  ;;  %v1992_v5 = vadd.f32 %v1991_v1, %v1943_v35 }
 0x2b1   : > { %v1945_v7 = vpop.f32.mrf.mxu0  ;;  %v1994_v12 = vpop.f32.mrf.mxu1 }
 0x2b2   : > { %2080 = vst [vmem:[%s3144_s28 + $0x14] sm:$0xf] %v2469_v4  ;;  %v2006_v9 = vadd.f32 %v1992_v5, %v314_v52  ;;  %v1946_v10 = vadd.f32 %v1945_v7, %v1897_v3 }
 0x2b3   : > { %v1947_v13 = vpop.f32.mrf.mxu0  ;;  %v1996_v17 = vpop.f32.mrf.mxu1 }
 0x2b4   : > { %v2471_v15 = vpack.c.bf16 %v2006_v9, %v2006_v9  ;;  %v1995_v16 = vadd.f32 %v1994_v12, %v1946_v10 }
 0x2b6   : > { %2082 = vst [vmem:[%s3144_s28 + $0x20] sm:$0xf] %v2471_v15  ;;  %v2009_v19 = vadd.f32 %v1995_v16, %v314_v52  ;;  %2092 = sbr.rel (!%p2804_p9) target bundleno = 723 (0x2d3), region = 56 }
 0x2b8   : > { %v2473_v20 = vpack.c.bf16 %v2009_v19, %v2009_v19 }
 0x2ba   : > { %2084 = vst [vmem:[%s3144_s28 + $0x2c] sm:$0xf] %v2473_v20 }
 0x2bb   : > { %2100 = vsyncadd %s2086_s8, 192  ;;  %s2474_s11 = smul.u32 192, %s2706_s15  ;;  %s2107_s10 = sshll.u32 %s3144_s28, 4  ;;  %s2108_s10 = int_to_ptr.vmem [resolvable:$true] %s2107_s10 }
 0x2bc   : > { %s2634_s5 = scalar_lea.vmem %s2108_s10, 576  ;;  %s2723_s22 = smov [#allocation9]  }
 0x2bd   : > { %s2105_s30 = scalar_lea.hbm %s3200_s3, %s2474_s11  ;;  %p2635_p5 = scmp.ne.s32.totalorder %s2108_s10, %s2634_s5 }
 0x2be   : > { %s2636_s0 = sshll.u32 %s2723_s22, 4  ;;  %s2637_s0 = int_to_ptr.vmem [resolvable:$false] %s2636_s0 }
 0x2bf   : > { %s2638_s9 = scalar_lea.vmem %s2637_s0, 1536  ;;  %p2639_p8 = scmp.lt.s32.totalorder %s2108_s10, %s2637_s0 }
 0x2c0   : > { %p2640_p9 = scmp.lt.s32.totalorder %s2638_s9, %s2634_s5 }
 0x2c2   : > { %p2641_p0 = por %p2640_p9, %p2639_p8 }
 0x2c4   : > { %p2642_p1 = pnand %p2641_p0, %p2635_p5 }
 0x2c6   : > { %2645 = shalt.err (!%p2642_p1)
}
 0x2c7   : > { %s2646_s25 = scalar_lea.hbm %s2105_s30, 576  ;;  %s2648_s20 = scalar_lea.hbm %s3200_s3, 1152 }
 0x2c8   : > { %p2647_p2 = scmp.ne.s32.totalorder %s2105_s30, %s2646_s25  ;;  %p2649_p3 = scmp.lt.s32.totalorder %s2105_s30, %s3200_s3 }
 0x2c9   : > { %p2650_p12 = scmp.lt.s32.totalorder %s2648_s20, %s2646_s25 }
 0x2cb   : > { %p2651_p4 = por %p2650_p12, %p2649_p3 }
 0x2cd   : > { %p2652_p6 = pnand %p2651_p4, %p2647_p2 }
 0x2cf   : > { %2655 = shalt.err (!%p2652_p6)
}
 0x2d0   : > { %s2724_s7 = smov 192   ;;  %s2725_s1 = smov 384  }
 0x2d1   : > { %s2726_s18 = smov 12  }
 0x2d2   : > { %2113 = dma.vmem_to_hbm [thread:$0]  %s2108_s10, 576, %s2105_s30, %s2086_s8, %s2724_s7, %s2725_s1, %s2726_s18  }
 0x2d3 PF: > { %s2122_s24 = sand.u32 1, %s2694_s12   ;;  %p3213_p7 = scmp.ge.s32.totalorder %s2714_s17, 2 }
 0x2d4   : > { %s2123_s28 = scalar_lea.sflag [#allocation5], %s2122_s24 }
 0x2d5   : > { %p2496_p10 = pnand %p3213_p7, %p2811_p11 }
 0x2d7   : > { %p2497_p13 = pneg %p2496_p10 }
 0x2d9   : > { %2689 = dma.done.wait (%p2497_p13), %s2123_s28, 768  }
 0x2da   : > { %2691 = vsyncadd (%p2497_p13), %s2123_s28, 4294966528  ;;  %s20_s17 = sadd.s32 1, %s2714_s17   ;;  %s3214_s4 = sld [smem:[#allocation13_spill]] }
 0x2db   : > { %p17_p5 = scmp.ge.s32.totalorder %s20_s17, 4   ;;  %s3215_s12 = smov %s2698_s13 }
 0x2dc   : > { %s3216_s13 = smov %s2702_s14  ;;  %s3217_s14 = smov %s2809_s26 }
 0x2dd   : > { %s3218_s15 = smov %s2710_s16  ;;  %19 = sbr.rel (!%p17_p5) target bundleno = 10 (0xa), region = 102 }
 0x2e0   : > { %s3219_s16 = smov %s3214_s4 }
 0x2e2   :  { %2128 = vsyncpa [#allocation4], 1 }
 0x2e3   :  { %2130 = vsyncpa [#allocation4 + $0x1], 1 }
 0x2e4   :  { %2131 = vsyncpa [#allocation7], 1 }
 0x2e5   :  { %2133 = vsyncpa [#allocation7 + $0x1], 1 }
 0x2e6   :  { %2134 = vsyncpa [#allocation5], 1 }
 0x2e7   :  { %2136 = vsyncpa [#allocation5 + $0x1], 1 }

</bundles_post_ra>
